<compile_context>
chip_gen: v6e
topology: v6e:2x2x1
jax: 0.10.0
libtpu: 0.0.40
codegen_flags: <defaults>
</compile_context>

<pallas_src>
import functools

import jax
import jax.numpy as jnp
from jax import lax
from jax.experimental import pallas as pl
from jax.experimental.pallas import tpu as pltpu


# ---------------------------------------------------------------------------
# in-kernel building blocks
# ---------------------------------------------------------------------------
def _group_norm_silu(h, agg, gamma, beta, group_size, eps):
    """GroupNorm (biased var, PyTorch semantics) + SiLU on a (C, L) slab.

    agg is a (C, C) same-group indicator matrix: (agg @ per_channel_stat)
    yields the per-group sum already broadcast back to every channel.
    """
    _, L = h.shape
    inv_l = 1.0 / L
    m_c = jnp.sum(h, axis=1, keepdims=True) * inv_l          # (C,1) E[x] per channel
    q_c = jnp.sum(h * h, axis=1, keepdims=True) * inv_l      # (C,1) E[x^2] per channel
    inv_gs = 1.0 / group_size
    mu = lax.dot(agg, m_c, precision=lax.Precision.HIGHEST,
                 preferred_element_type=jnp.float32) * inv_gs
    ex2 = lax.dot(agg, q_c, precision=lax.Precision.HIGHEST,
                  preferred_element_type=jnp.float32) * inv_gs
    var = ex2 - mu * mu
    hn = (h - mu) * lax.rsqrt(var + eps) * gamma + beta
    return hn * jax.nn.sigmoid(hn)                            # SiLU


def _conv3(h, w_ref, bias, d):
    """3-tap dilated conv (stride 1, 'same' padding = d) on a (Cin, L) slab.

    w_ref: (3, Cout, Cin) bf16 taps; bias: (Cout, 1) f32.
    out[:, l] = W0 @ h[:, l-d] + W1 @ h[:, l] + W2 @ h[:, l+d] + bias
    (zero outside [0, L)), exactly PyTorch Conv1d(k=3, padding=d, dilation=d).
    """
    C, L = h.shape
    z = jnp.zeros((C, d), dtype=h.dtype)
    h_m = jnp.concatenate([z, h[:, :L - d]], axis=1)   # h[:, l-d], zeros on the left
    h_p = jnp.concatenate([h[:, d:], z], axis=1)       # h[:, l+d], zeros on the right

    def mm(w, a):
        return lax.dot(w, a.astype(jnp.bfloat16),
                       preferred_element_type=jnp.float32)

    acc = mm(w_ref[0], h_m)
    acc = acc + mm(w_ref[1], h)
    acc = acc + mm(w_ref[2], h_p)
    return acc + bias


def _resnet_block_kernel(x_ref, agg1_ref, g1_ref, b1_ref, w1_ref, cb1_ref,
                         agg2_ref, g2_ref, b2_ref, w2_ref, cb2_ref,
                         *rest, gs1, gs2, eps, d1, d2, shortcut_mode):
    o_ref = rest[-1]
    x = x_ref[0]                                               # (Cin, L) f32

    h = _group_norm_silu(x, agg1_ref[...], g1_ref[...], b1_ref[...], gs1, eps)
    h = _conv3(h, w1_ref, cb1_ref[...], d1)
    h = _group_norm_silu(h, agg2_ref[...], g2_ref[...], b2_ref[...], gs2, eps)
    # dropout: eval-mode identity.
    # TODO(synk): training-mode dropout (pltpu.prng_*) not implemented.
    h = _conv3(h, w2_ref, cb2_ref[...], d2)

    if shortcut_mode == "identity":
        sc = x
    elif shortcut_mode == "nin":                               # 1x1 conv shortcut
        ws, bs = rest[0][...], rest[1][...]
        sc = lax.dot(ws, x.astype(jnp.bfloat16),
                     preferred_element_type=jnp.float32) + bs
    else:                                                      # 3x3 conv shortcut
        sc = _conv3(x, rest[0], rest[1][...], 1)

    o_ref[0] = (sc + h).astype(o_ref.dtype)


# ---------------------------------------------------------------------------
# Module
# ---------------------------------------------------------------------------
class ResnetBlock:
    def __init__(self, *, in_channels, out_channels=None, conv_shortcut=False,
                 dropout=0.0, temb_channels=512, dims=1, num_groups=32,
                 use_checkpoint=False, dilations=(1, 1), key=None):
        if dims != 1:
            # TODO(synk): dims=2 (Conv2d) variant not implemented; default dims=1 only.
            raise NotImplementedError("Only dims=1 (Conv1d) is implemented.")
        out_channels = in_channels if out_channels is None else out_channels
        assert in_channels % num_groups == 0 and out_channels % num_groups == 0
        self.in_channels = in_channels
        self.out_channels = out_channels
        self.use_conv_shortcut = conv_shortcut
        self.num_groups = num_groups
        self.dilations = tuple(dilations)
        self.eps = 1e-6
        self.dropout_p = dropout          # eval-mode forward: dropout is identity
        # NOTE: temb_proj / use_checkpoint exist in the torch module but do not
        # affect the (temb-free) forward pass, so they are omitted here.

        if key is None:
            key = jax.random.PRNGKey(0)
        ks = jax.random.split(key, 8)

        def conv_init(k, co, ci, ksz):
            bound = (ci * ksz) ** -0.5
            kw, kb = jax.random.split(k)
            w = jax.random.uniform(kw, (co, ci, ksz), jnp.float32, -bound, bound)
            b = jax.random.uniform(kb, (co,), jnp.float32, -bound, bound)
            return w, b

        # GroupNorm affine params (randomized to exercise the affine path).
        self.gn1_w = 1.0 + 0.1 * jax.random.normal(ks[0], (in_channels,), jnp.float32)
        self.gn1_b = 0.1 * jax.random.normal(ks[1], (in_channels,), jnp.float32)
        self.gn2_w = 1.0 + 0.1 * jax.random.normal(ks[2], (out_channels,), jnp.float32)
        self.gn2_b = 0.1 * jax.random.normal(ks[3], (out_channels,), jnp.float32)

        self.conv1_w, self.conv1_b = conv_init(ks[4], out_channels, in_channels, 3)
        self.conv2_w, self.conv2_b = conv_init(ks[5], out_channels, out_channels, 3)
        if in_channels != out_channels:
            ksz = 3 if conv_shortcut else 1
            self.sc_w, self.sc_b = conv_init(ks[6], out_channels, in_channels, ksz)

        # ---- kernel-side prepacked parameters ----
        def group_agg(c):
            g = jnp.arange(c) // (c // num_groups)
            return (g[:, None] == g[None, :]).astype(jnp.float32)

        self._agg1 = group_agg(in_channels)
        self._g1 = self.gn1_w.reshape(-1, 1)
        self._b1 = self.gn1_b.reshape(-1, 1)
        self._agg2 = group_agg(out_channels)
        self._g2 = self.gn2_w.reshape(-1, 1)
        self._b2 = self.gn2_b.reshape(-1, 1)
        # conv taps packed (3, Cout, Cin), bf16 (MXU-native, half the VMEM/HBM).
        self._w1 = jnp.transpose(self.conv1_w, (2, 0, 1)).astype(jnp.bfloat16)
        self._w2 = jnp.transpose(self.conv2_w, (2, 0, 1)).astype(jnp.bfloat16)
        self._cb1 = self.conv1_b.reshape(-1, 1)
        self._cb2 = self.conv2_b.reshape(-1, 1)
        if in_channels != out_channels:
            if conv_shortcut:
                self._ws = jnp.transpose(self.sc_w, (2, 0, 1)).astype(jnp.bfloat16)
            else:
                self._ws = self.sc_w[:, :, 0].astype(jnp.bfloat16)
            self._bs = self.sc_b.reshape(-1, 1)

    def __call__(self, x):
        B, Cin, L = x.shape
        assert Cin == self.in_channels
        Cout = self.out_channels

        if self.in_channels == self.out_channels:
            mode = "identity"
        elif self.use_conv_shortcut:
            mode = "conv"
        else:
            mode = "nin"

        def const_spec(a):
            if a.ndim == 2:
                return pl.BlockSpec(a.shape, lambda b: (0, 0))
            return pl.BlockSpec(a.shape, lambda b: (0, 0, 0))

        params = [self._agg1, self._g1, self._b1, self._w1, self._cb1,
                  self._agg2, self._g2, self._b2, self._w2, self._cb2]
        if mode != "identity":
            params += [self._ws, self._bs]

        in_specs = [pl.BlockSpec((1, Cin, L), lambda b: (b, 0, 0))]
        in_specs += [const_spec(p) for p in params]
        out_spec = pl.BlockSpec((1, Cout, L), lambda b: (b, 0, 0))

        kernel = functools.partial(
            _resnet_block_kernel,
            gs1=Cin // self.num_groups,
            gs2=Cout // self.num_groups,
            eps=self.eps,
            d1=self.dilations[0],
            d2=self.dilations[1],
            shortcut_mode=mode,
        )
        return pl.pallas_call(
            kernel,
            out_shape=jax.ShapeDtypeStruct((B, Cout, L), x.dtype),
            grid=(B,),
            in_specs=in_specs,
            out_specs=out_spec,
            compiler_params=pltpu.CompilerParams(
                dimension_semantics=("parallel",)),
        )(x, *params)


# ---------------------------------------------------------------------------
# Pure-JAX reference (f32, HIGHEST precision)
# ---------------------------------------------------------------------------
def _reference_forward(m, x):
    G, eps = m.num_groups, m.eps

    def gn(h, w, b):
        B, C, L = h.shape
        hg = h.reshape(B, G, -1)
        mu = jnp.mean(hg, axis=-1, keepdims=True)
        var = jnp.mean((hg - mu) ** 2, axis=-1, keepdims=True)
        hn = ((hg - mu) / jnp.sqrt(var + eps)).reshape(B, C, L)
        return hn * w[None, :, None] + b[None, :, None]

    def silu(h):
        return h * jax.nn.sigmoid(h)

    def conv1d(h, w, b, dil):
        pad = dil * (w.shape[-1] // 2)
        return lax.conv_general_dilated(
            h, w, window_strides=(1,), padding=[(pad, pad)],
            rhs_dilation=(dil,), dimension_numbers=("NCH", "OIH", "NCH"),
            precision=lax.Precision.HIGHEST) + b[None, :, None]

    h = silu(gn(x, m.gn1_w, m.gn1_b))
    h = conv1d(h, m.conv1_w, m.conv1_b, m.dilations[0])
    h = silu(gn(h, m.gn2_w, m.gn2_b))
    h = conv1d(h, m.conv2_w, m.conv2_b, m.dilations[1])
    xs = x
    if m.in_channels != m.out_channels:
        xs = conv1d(x, m.sc_w, m.sc_b, 1)
    return xs + h


# ---------------------------------------------------------------------------
# Test
# ---------------------------------------------------------------------------
if __name__ == "__main__":
    key = jax.random.PRNGKey(0)
    B, L = 2, 16

    configs = [
        dict(in_channels=32, out_channels=32, conv_shortcut=False,
             num_groups=8, dilations=(1, 1)),     # identity shortcut
        dict(in_channels=32, out_channels=64, conv_shortcut=False,
             num_groups=32, dilations=(2, 1)),    # 1x1 nin shortcut, dilation 2
        dict(in_channels=32, out_channels=64, conv_shortcut=True,
             num_groups=8, dilations=(1, 1)),     # 3x3 conv shortcut
    ]

    for cfg in configs:
        kx, kp, key = jax.random.split(key, 3)
        x = jax.random.normal(kx, (B, cfg["in_channels"], L), jnp.float32)
        m = ResnetBlock(dropout=0.0, dims=1, key=kp, **cfg)
        y = jax.block_until_ready(m(x))
        y_ref = _reference_forward(m, x)
        assert y.shape == (B, cfg["out_channels"], L), y.shape
        # bf16 MXU path vs f32 HIGHEST reference -> loose-ish tolerance.
        assert jnp.allclose(y, y_ref, atol=5e-2, rtol=5e-2), (
            float(jnp.max(jnp.abs(y - y_ref))))

    print("KERNEL_OK")
</pallas_src>

<mosaic_0001>
module attributes {stable_mosaic.version = 11 : i64} {
  func.func @_resnet_block_kernel(%arg0: i32, %arg1: memref<1x32x16xf32, #tpu.memory_space<vmem>>, %arg2: memref<32x32xf32, #tpu.memory_space<vmem>>, %arg3: memref<32x1xf32, #tpu.memory_space<vmem>>, %arg4: memref<32x1xf32, #tpu.memory_space<vmem>>, %arg5: memref<3x32x32xbf16, #tpu.memory_space<vmem>>, %arg6: memref<32x1xf32, #tpu.memory_space<vmem>>, %arg7: memref<32x32xf32, #tpu.memory_space<vmem>>, %arg8: memref<32x1xf32, #tpu.memory_space<vmem>>, %arg9: memref<32x1xf32, #tpu.memory_space<vmem>>, %arg10: memref<3x32x32xbf16, #tpu.memory_space<vmem>>, %arg11: memref<32x1xf32, #tpu.memory_space<vmem>>, %arg12: memref<1x32x16xf32, #tpu.memory_space<vmem>>) attributes {dimension_semantics = [#tpu.dimension_semantics<parallel>], iteration_bounds = array<i64: 2>, scalar_prefetch = 0 : i64, scratch_operands = 0 : i64, tpu.core_type = #tpu.core_type<tc>, window_params = [{transform_indices = @transform_0, window_bounds = array<i64: 1, 32, 16>}, {pipeline_mode = #tpu.pipeline_mode<synchronous>, transform_indices = @transform_1, window_bounds = array<i64: 32, 32>}, {pipeline_mode = #tpu.pipeline_mode<synchronous>, transform_indices = @transform_2, window_bounds = array<i64: 32, 1>}, {pipeline_mode = #tpu.pipeline_mode<synchronous>, transform_indices = @transform_3, window_bounds = array<i64: 32, 1>}, {pipeline_mode = #tpu.pipeline_mode<synchronous>, transform_indices = @transform_4, window_bounds = array<i64: 3, 32, 32>}, {pipeline_mode = #tpu.pipeline_mode<synchronous>, transform_indices = @transform_5, window_bounds = array<i64: 32, 1>}, {pipeline_mode = #tpu.pipeline_mode<synchronous>, transform_indices = @transform_6, window_bounds = array<i64: 32, 32>}, {pipeline_mode = #tpu.pipeline_mode<synchronous>, transform_indices = @transform_7, window_bounds = array<i64: 32, 1>}, {pipeline_mode = #tpu.pipeline_mode<synchronous>, transform_indices = @transform_8, window_bounds = array<i64: 32, 1>}, {pipeline_mode = #tpu.pipeline_mode<synchronous>, transform_indices = @transform_9, window_bounds = array<i64: 3, 32, 32>}, {pipeline_mode = #tpu.pipeline_mode<synchronous>, transform_indices = @transform_10, window_bounds = array<i64: 32, 1>}, {transform_indices = @transform_11, window_bounds = array<i64: 1, 32, 16>}]} {
    %c0 = arith.constant 0 : index
    %c0_0 = arith.constant 0 : index
    %c0_1 = arith.constant 0 : index
    %0 = vector.load %arg1[%c0, %c0_0, %c0_1] : memref<1x32x16xf32, #tpu.memory_space<vmem>>, vector<1x32x16xf32>
    %1 = vector.shape_cast %0 : vector<1x32x16xf32> to vector<32x16xf32>
    %c0_2 = arith.constant 0 : index
    %c0_3 = arith.constant 0 : index
    %2 = vector.load %arg2[%c0_2, %c0_3] : memref<32x32xf32, #tpu.memory_space<vmem>>, vector<32x32xf32>
    %c0_4 = arith.constant 0 : index
    %c0_5 = arith.constant 0 : index
    %3 = vector.load %arg3[%c0_4, %c0_5] : memref<32x1xf32, #tpu.memory_space<vmem>>, vector<32x1xf32>
    %c0_6 = arith.constant 0 : index
    %c0_7 = arith.constant 0 : index
    %4 = vector.load %arg4[%c0_6, %c0_7] : memref<32x1xf32, #tpu.memory_space<vmem>>, vector<32x1xf32>
    %cst = arith.constant dense<0.000000e+00> : vector<32xf32>
    %5 = vector.multi_reduction <add>, %1, %cst [1] : vector<32x16xf32> to vector<32xf32>
    %6 = vector.shape_cast %5 : vector<32xf32> to vector<32x1xf32>
    %cst_8 = arith.constant 6.250000e-02 : f32
    %7 = vector.broadcast %cst_8 : f32 to vector<32x1xf32>
    %8 = arith.mulf %6, %7 : vector<32x1xf32>
    %9 = arith.mulf %1, %1 : vector<32x16xf32>
    %cst_9 = arith.constant dense<0.000000e+00> : vector<32xf32>
    %10 = vector.multi_reduction <add>, %9, %cst_9 [1] : vector<32x16xf32> to vector<32xf32>
    %11 = vector.shape_cast %10 : vector<32xf32> to vector<32x1xf32>
    %cst_10 = arith.constant 6.250000e-02 : f32
    %12 = vector.broadcast %cst_10 : f32 to vector<32x1xf32>
    %13 = arith.mulf %11, %12 : vector<32x1xf32>
    %cst_11 = arith.constant dense<0.000000e+00> : vector<32x1xf32>
    %14 = tpu.matmul %2, %8, %cst_11 {dimension_numbers = #tpu.dot_dimension_numbers<[1], [0], [0], [1], [0, 0, 1, 1], [], []>, precision = #tpu.contract_precision<fp32>} : vector<32x32xf32>, vector<32x1xf32>, vector<32x1xf32> -> vector<32x1xf32>
    %cst_12 = arith.constant 2.500000e-01 : f32
    %15 = vector.broadcast %cst_12 : f32 to vector<32x1xf32>
    %16 = arith.mulf %14, %15 : vector<32x1xf32>
    %cst_13 = arith.constant dense<0.000000e+00> : vector<32x1xf32>
    %17 = tpu.matmul %2, %13, %cst_13 {dimension_numbers = #tpu.dot_dimension_numbers<[1], [0], [0], [1], [0, 0, 1, 1], [], []>, precision = #tpu.contract_precision<fp32>} : vector<32x32xf32>, vector<32x1xf32>, vector<32x1xf32> -> vector<32x1xf32>
    %cst_14 = arith.constant 2.500000e-01 : f32
    %18 = vector.broadcast %cst_14 : f32 to vector<32x1xf32>
    %19 = arith.mulf %17, %18 : vector<32x1xf32>
    %20 = arith.mulf %16, %16 : vector<32x1xf32>
    %21 = arith.subf %19, %20 : vector<32x1xf32>
    %22 = vector.broadcast %16 : vector<32x1xf32> to vector<32x16xf32>
    %23 = arith.subf %1, %22 : vector<32x16xf32>
    %cst_15 = arith.constant 9.99999997E-7 : f32
    %24 = vector.broadcast %cst_15 : f32 to vector<32x1xf32>
    %25 = arith.addf %21, %24 : vector<32x1xf32>
    %26 = math.rsqrt %25 : vector<32x1xf32>
    %27 = vector.broadcast %26 : vector<32x1xf32> to vector<32x16xf32>
    %28 = arith.mulf %23, %27 : vector<32x16xf32>
    %29 = vector.broadcast %3 : vector<32x1xf32> to vector<32x16xf32>
    %30 = arith.mulf %28, %29 : vector<32x16xf32>
    %31 = vector.broadcast %4 : vector<32x1xf32> to vector<32x16xf32>
    %32 = arith.addf %30, %31 : vector<32x16xf32>
    %33 = arith.negf %32 : vector<32x16xf32>
    %34 = math.exp %33 : vector<32x16xf32>
    %cst_16 = arith.constant 1.000000e+00 : f32
    %35 = vector.broadcast %cst_16 : f32 to vector<32x16xf32>
    %36 = arith.addf %35, %34 : vector<32x16xf32>
    %37 = arith.divf %35, %36 : vector<32x16xf32>
    %38 = arith.mulf %32, %37 : vector<32x16xf32>
    %c0_17 = arith.constant 0 : index
    %c0_18 = arith.constant 0 : index
    %39 = vector.load %arg6[%c0_17, %c0_18] : memref<32x1xf32, #tpu.memory_space<vmem>>, vector<32x1xf32>
    %cst_19 = arith.constant 0.000000e+00 : f32
    %40 = vector.broadcast %cst_19 : f32 to vector<32x1xf32>
    %41 = vector.extract_strided_slice %38 {offsets = [0, 0], sizes = [32, 15], strides = [1, 1]} : vector<32x16xf32> to vector<32x15xf32>
    %42 = tpu.concatenate %40, %41 in 1 : vector<32x1xf32>, vector<32x15xf32> -> vector<32x16xf32>
    %43 = vector.extract_strided_slice %38 {offsets = [0, 1], sizes = [32, 15], strides = [1, 1]} : vector<32x16xf32> to vector<32x15xf32>
    %44 = tpu.concatenate %43, %40 in 1 : vector<32x15xf32>, vector<32x1xf32> -> vector<32x16xf32>
    %c0_20 = arith.constant 0 : index
    %c0_21 = arith.constant 0 : index
    %c0_22 = arith.constant 0 : index
    %45 = vector.load %arg5[%c0_20, %c0_21, %c0_22] : memref<3x32x32xbf16, #tpu.memory_space<vmem>>, vector<1x32x32xbf16>
    %46 = vector.shape_cast %45 : vector<1x32x32xbf16> to vector<32x32xbf16>
    %47 = arith.truncf %42 : vector<32x16xf32> to vector<32x16xbf16>
    %cst_23 = arith.constant dense<0.000000e+00> : vector<32x16xf32>
    %48 = tpu.matmul %46, %47, %cst_23 {dimension_numbers = #tpu.dot_dimension_numbers<[1], [0], [0], [1], [0, 0, 1, 1], [], []>} : vector<32x32xbf16>, vector<32x16xbf16>, vector<32x16xf32> -> vector<32x16xf32>
    %c1 = arith.constant 1 : index
    %c0_24 = arith.constant 0 : index
    %c0_25 = arith.constant 0 : index
    %49 = vector.load %arg5[%c1, %c0_24, %c0_25] : memref<3x32x32xbf16, #tpu.memory_space<vmem>>, vector<1x32x32xbf16>
    %50 = vector.shape_cast %49 : vector<1x32x32xbf16> to vector<32x32xbf16>
    %51 = arith.truncf %38 : vector<32x16xf32> to vector<32x16xbf16>
    %cst_26 = arith.constant dense<0.000000e+00> : vector<32x16xf32>
    %52 = tpu.matmul %50, %51, %cst_26 {dimension_numbers = #tpu.dot_dimension_numbers<[1], [0], [0], [1], [0, 0, 1, 1], [], []>} : vector<32x32xbf16>, vector<32x16xbf16>, vector<32x16xf32> -> vector<32x16xf32>
    %53 = arith.addf %48, %52 : vector<32x16xf32>
    %c2 = arith.constant 2 : index
    %c0_27 = arith.constant 0 : index
    %c0_28 = arith.constant 0 : index
    %54 = vector.load %arg5[%c2, %c0_27, %c0_28] : memref<3x32x32xbf16, #tpu.memory_space<vmem>>, vector<1x32x32xbf16>
    %55 = vector.shape_cast %54 : vector<1x32x32xbf16> to vector<32x32xbf16>
    %56 = arith.truncf %44 : vector<32x16xf32> to vector<32x16xbf16>
    %cst_29 = arith.constant dense<0.000000e+00> : vector<32x16xf32>
    %57 = tpu.matmul %55, %56, %cst_29 {dimension_numbers = #tpu.dot_dimension_numbers<[1], [0], [0], [1], [0, 0, 1, 1], [], []>} : vector<32x32xbf16>, vector<32x16xbf16>, vector<32x16xf32> -> vector<32x16xf32>
    %58 = arith.addf %53, %57 : vector<32x16xf32>
    %59 = vector.broadcast %39 : vector<32x1xf32> to vector<32x16xf32>
    %60 = arith.addf %58, %59 : vector<32x16xf32>
    %c0_30 = arith.constant 0 : index
    %c0_31 = arith.constant 0 : index
    %61 = vector.load %arg7[%c0_30, %c0_31] : memref<32x32xf32, #tpu.memory_space<vmem>>, vector<32x32xf32>
    %c0_32 = arith.constant 0 : index
    %c0_33 = arith.constant 0 : index
    %62 = vector.load %arg8[%c0_32, %c0_33] : memref<32x1xf32, #tpu.memory_space<vmem>>, vector<32x1xf32>
    %c0_34 = arith.constant 0 : index
    %c0_35 = arith.constant 0 : index
    %63 = vector.load %arg9[%c0_34, %c0_35] : memref<32x1xf32, #tpu.memory_space<vmem>>, vector<32x1xf32>
    %cst_36 = arith.constant dense<0.000000e+00> : vector<32xf32>
    %64 = vector.multi_reduction <add>, %60, %cst_36 [1] : vector<32x16xf32> to vector<32xf32>
    %65 = vector.shape_cast %64 : vector<32xf32> to vector<32x1xf32>
    %cst_37 = arith.constant 6.250000e-02 : f32
    %66 = vector.broadcast %cst_37 : f32 to vector<32x1xf32>
    %67 = arith.mulf %65, %66 : vector<32x1xf32>
    %68 = arith.mulf %60, %60 : vector<32x16xf32>
    %cst_38 = arith.constant dense<0.000000e+00> : vector<32xf32>
    %69 = vector.multi_reduction <add>, %68, %cst_38 [1] : vector<32x16xf32> to vector<32xf32>
    %70 = vector.shape_cast %69 : vector<32xf32> to vector<32x1xf32>
    %cst_39 = arith.constant 6.250000e-02 : f32
    %71 = vector.broadcast %cst_39 : f32 to vector<32x1xf32>
    %72 = arith.mulf %70, %71 : vector<32x1xf32>
    %cst_40 = arith.constant dense<0.000000e+00> : vector<32x1xf32>
    %73 = tpu.matmul %61, %67, %cst_40 {dimension_numbers = #tpu.dot_dimension_numbers<[1], [0], [0], [1], [0, 0, 1, 1], [], []>, precision = #tpu.contract_precision<fp32>} : vector<32x32xf32>, vector<32x1xf32>, vector<32x1xf32> -> vector<32x1xf32>
    %cst_41 = arith.constant 2.500000e-01 : f32
    %74 = vector.broadcast %cst_41 : f32 to vector<32x1xf32>
    %75 = arith.mulf %73, %74 : vector<32x1xf32>
    %cst_42 = arith.constant dense<0.000000e+00> : vector<32x1xf32>
    %76 = tpu.matmul %61, %72, %cst_42 {dimension_numbers = #tpu.dot_dimension_numbers<[1], [0], [0], [1], [0, 0, 1, 1], [], []>, precision = #tpu.contract_precision<fp32>} : vector<32x32xf32>, vector<32x1xf32>, vector<32x1xf32> -> vector<32x1xf32>
    %cst_43 = arith.constant 2.500000e-01 : f32
    %77 = vector.broadcast %cst_43 : f32 to vector<32x1xf32>
    %78 = arith.mulf %76, %77 : vector<32x1xf32>
    %79 = arith.mulf %75, %75 : vector<32x1xf32>
    %80 = arith.subf %78, %79 : vector<32x1xf32>
    %81 = vector.broadcast %75 : vector<32x1xf32> to vector<32x16xf32>
    %82 = arith.subf %60, %81 : vector<32x16xf32>
    %cst_44 = arith.constant 9.99999997E-7 : f32
    %83 = vector.broadcast %cst_44 : f32 to vector<32x1xf32>
    %84 = arith.addf %80, %83 : vector<32x1xf32>
    %85 = math.rsqrt %84 : vector<32x1xf32>
    %86 = vector.broadcast %85 : vector<32x1xf32> to vector<32x16xf32>
    %87 = arith.mulf %82, %86 : vector<32x16xf32>
    %88 = vector.broadcast %62 : vector<32x1xf32> to vector<32x16xf32>
    %89 = arith.mulf %87, %88 : vector<32x16xf32>
    %90 = vector.broadcast %63 : vector<32x1xf32> to vector<32x16xf32>
    %91 = arith.addf %89, %90 : vector<32x16xf32>
    %92 = arith.negf %91 : vector<32x16xf32>
    %93 = math.exp %92 : vector<32x16xf32>
    %cst_45 = arith.constant 1.000000e+00 : f32
    %94 = vector.broadcast %cst_45 : f32 to vector<32x16xf32>
    %95 = arith.addf %94, %93 : vector<32x16xf32>
    %96 = arith.divf %94, %95 : vector<32x16xf32>
    %97 = arith.mulf %91, %96 : vector<32x16xf32>
    %c0_46 = arith.constant 0 : index
    %c0_47 = arith.constant 0 : index
    %98 = vector.load %arg11[%c0_46, %c0_47] : memref<32x1xf32, #tpu.memory_space<vmem>>, vector<32x1xf32>
    %cst_48 = arith.constant 0.000000e+00 : f32
    %99 = vector.broadcast %cst_48 : f32 to vector<32x1xf32>
    %100 = vector.extract_strided_slice %97 {offsets = [0, 0], sizes = [32, 15], strides = [1, 1]} : vector<32x16xf32> to vector<32x15xf32>
    %101 = tpu.concatenate %99, %100 in 1 : vector<32x1xf32>, vector<32x15xf32> -> vector<32x16xf32>
    %102 = vector.extract_strided_slice %97 {offsets = [0, 1], sizes = [32, 15], strides = [1, 1]} : vector<32x16xf32> to vector<32x15xf32>
    %103 = tpu.concatenate %102, %99 in 1 : vector<32x15xf32>, vector<32x1xf32> -> vector<32x16xf32>
    %c0_49 = arith.constant 0 : index
    %c0_50 = arith.constant 0 : index
    %c0_51 = arith.constant 0 : index
    %104 = vector.load %arg10[%c0_49, %c0_50, %c0_51] : memref<3x32x32xbf16, #tpu.memory_space<vmem>>, vector<1x32x32xbf16>
    %105 = vector.shape_cast %104 : vector<1x32x32xbf16> to vector<32x32xbf16>
    %106 = arith.truncf %101 : vector<32x16xf32> to vector<32x16xbf16>
    %cst_52 = arith.constant dense<0.000000e+00> : vector<32x16xf32>
    %107 = tpu.matmul %105, %106, %cst_52 {dimension_numbers = #tpu.dot_dimension_numbers<[1], [0], [0], [1], [0, 0, 1, 1], [], []>} : vector<32x32xbf16>, vector<32x16xbf16>, vector<32x16xf32> -> vector<32x16xf32>
    %c1_53 = arith.constant 1 : index
    %c0_54 = arith.constant 0 : index
    %c0_55 = arith.constant 0 : index
    %108 = vector.load %arg10[%c1_53, %c0_54, %c0_55] : memref<3x32x32xbf16, #tpu.memory_space<vmem>>, vector<1x32x32xbf16>
    %109 = vector.shape_cast %108 : vector<1x32x32xbf16> to vector<32x32xbf16>
    %110 = arith.truncf %97 : vector<32x16xf32> to vector<32x16xbf16>
    %cst_56 = arith.constant dense<0.000000e+00> : vector<32x16xf32>
    %111 = tpu.matmul %109, %110, %cst_56 {dimension_numbers = #tpu.dot_dimension_numbers<[1], [0], [0], [1], [0, 0, 1, 1], [], []>} : vector<32x32xbf16>, vector<32x16xbf16>, vector<32x16xf32> -> vector<32x16xf32>
    %112 = arith.addf %107, %111 : vector<32x16xf32>
    %c2_57 = arith.constant 2 : index
    %c0_58 = arith.constant 0 : index
    %c0_59 = arith.constant 0 : index
    %113 = vector.load %arg10[%c2_57, %c0_58, %c0_59] : memref<3x32x32xbf16, #tpu.memory_space<vmem>>, vector<1x32x32xbf16>
    %114 = vector.shape_cast %113 : vector<1x32x32xbf16> to vector<32x32xbf16>
    %115 = arith.truncf %103 : vector<32x16xf32> to vector<32x16xbf16>
    %cst_60 = arith.constant dense<0.000000e+00> : vector<32x16xf32>
    %116 = tpu.matmul %114, %115, %cst_60 {dimension_numbers = #tpu.dot_dimension_numbers<[1], [0], [0], [1], [0, 0, 1, 1], [], []>} : vector<32x32xbf16>, vector<32x16xbf16>, vector<32x16xf32> -> vector<32x16xf32>
    %117 = arith.addf %112, %116 : vector<32x16xf32>
    %118 = vector.broadcast %98 : vector<32x1xf32> to vector<32x16xf32>
    %119 = arith.addf %117, %118 : vector<32x16xf32>
    %120 = arith.addf %1, %119 : vector<32x16xf32>
    %c0_61 = arith.constant 0 : index
    %c0_62 = arith.constant 0 : index
    %c0_63 = arith.constant 0 : index
    %121 = vector.load %arg12[%c0_61, %c0_62, %c0_63] : memref<1x32x16xf32, #tpu.memory_space<vmem>>, vector<1x32x16xf32>
    %122 = vector.shape_cast %121 : vector<1x32x16xf32> to vector<32x16xf32>
    %123 = vector.shape_cast %120 : vector<32x16xf32> to vector<1x32x16xf32>
    tpu.vector_store %arg12[%c0_61, %c0_62, %c0_63], %123 {strides = array<i32>} : memref<1x32x16xf32, #tpu.memory_space<vmem>>, vector<1x32x16xf32>,
    return
  }
  func.func @transform_0(%arg0: i32) -> (i32, i32, i32) {
    %c0_i32 = arith.constant 0 : i32
    %c0_i32_0 = arith.constant 0 : i32
    %c0_i32_1 = arith.constant 0 : i32
    return %arg0, %c0_i32, %c0_i32_0 : i32, i32, i32
  }
  func.func @transform_1(%arg0: i32) -> (i32, i32) {
    %c0_i32 = arith.constant 0 : i32
    %c0_i32_0 = arith.constant 0 : i32
    %c0_i32_1 = arith.constant 0 : i32
    return %c0_i32, %c0_i32_0 : i32, i32
  }
  func.func @transform_2(%arg0: i32) -> (i32, i32) {
    %c0_i32 = arith.constant 0 : i32
    %c0_i32_0 = arith.constant 0 : i32
    %c0_i32_1 = arith.constant 0 : i32
    return %c0_i32, %c0_i32_0 : i32, i32
  }
  func.func @transform_3(%arg0: i32) -> (i32, i32) {
    %c0_i32 = arith.constant 0 : i32
    %c0_i32_0 = arith.constant 0 : i32
    %c0_i32_1 = arith.constant 0 : i32
    return %c0_i32, %c0_i32_0 : i32, i32
  }
  func.func @transform_4(%arg0: i32) -> (i32, i32, i32) {
    %c0_i32 = arith.constant 0 : i32
    %c0_i32_0 = arith.constant 0 : i32
    %c0_i32_1 = arith.constant 0 : i32
    %c0_i32_2 = arith.constant 0 : i32
    return %c0_i32, %c0_i32_0, %c0_i32_1 : i32, i32, i32
  }
  func.func @transform_5(%arg0: i32) -> (i32, i32) {
    %c0_i32 = arith.constant 0 : i32
    %c0_i32_0 = arith.constant 0 : i32
    %c0_i32_1 = arith.constant 0 : i32
    return %c0_i32, %c0_i32_0 : i32, i32
  }
  func.func @transform_6(%arg0: i32) -> (i32, i32) {
    %c0_i32 = arith.constant 0 : i32
    %c0_i32_0 = arith.constant 0 : i32
    %c0_i32_1 = arith.constant 0 : i32
    return %c0_i32, %c0_i32_0 : i32, i32
  }
  func.func @transform_7(%arg0: i32) -> (i32, i32) {
    %c0_i32 = arith.constant 0 : i32
    %c0_i32_0 = arith.constant 0 : i32
    %c0_i32_1 = arith.constant 0 : i32
    return %c0_i32, %c0_i32_0 : i32, i32
  }
  func.func @transform_8(%arg0: i32) -> (i32, i32) {
    %c0_i32 = arith.constant 0 : i32
    %c0_i32_0 = arith.constant 0 : i32
    %c0_i32_1 = arith.constant 0 : i32
    return %c0_i32, %c0_i32_0 : i32, i32
  }
  func.func @transform_9(%arg0: i32) -> (i32, i32, i32) {
    %c0_i32 = arith.constant 0 : i32
    %c0_i32_0 = arith.constant 0 : i32
    %c0_i32_1 = arith.constant 0 : i32
    %c0_i32_2 = arith.constant 0 : i32
    return %c0_i32, %c0_i32_0, %c0_i32_1 : i32, i32, i32
  }
  func.func @transform_10(%arg0: i32) -> (i32, i32) {
    %c0_i32 = arith.constant 0 : i32
    %c0_i32_0 = arith.constant 0 : i32
    %c0_i32_1 = arith.constant 0 : i32
    return %c0_i32, %c0_i32_0 : i32, i32
  }
  func.func @transform_11(%arg0: i32) -> (i32, i32, i32) {
    %c0_i32 = arith.constant 0 : i32
    %c0_i32_0 = arith.constant 0 : i32
    %c0_i32_1 = arith.constant 0 : i32
    return %arg0, %c0_i32, %c0_i32_0 : i32, i32, i32
  }
}

</mosaic_0001>

<bundles_post_ra>
// kernel: tpu_custom_call.1
= control target key start
LH: loop header
LB: loop body
LE: loop exit
PB: predicated region body
PF: predicated region fallthrough
CT: control target
= control target key end

     0   :  { %s4778_s17 = smov 0   ;;  %s5426_s0 = inlined_call_operand.vmem [shape: f32[2,32,16], index: 0, kind: input, shape index: {}]   ;;  %s5427_s1 = inlined_call_operand.vmem [shape: f32[32,32], index: 1, kind: input, shape index: {}]   ;;  %s5428_s2 = inlined_call_operand.vmem [shape: f32[32,1], index: 2, kind: input, shape index: {}]   ;;  %s5429_s3 = inlined_call_operand.vmem [shape: f32[32,1], index: 3, kind: input, shape index: {}]   ;;  %s5430_s4 = inlined_call_operand.vmem [shape: bf16[3,32,32], index: 4, kind: input, shape index: {}]   ;;  %s5431_s5 = inlined_call_operand.vmem [shape: f32[32,1], index: 5, kind: input, shape index: {}]   ;;  %s5432_s6 = inlined_call_operand.vmem [shape: f32[32,32], index: 6, kind: input, shape index: {}]   ;;  %s5433_s7 = inlined_call_operand.vmem [shape: f32[32,1], index: 7, kind: input, shape index: {}]   ;;  %s5434_s8 = inlined_call_operand.vmem [shape: f32[32,1], index: 8, kind: input, shape index: {}]   ;;  %s5435_s9 = inlined_call_operand.vmem [shape: bf16[3,32,32], index: 9, kind: input, shape index: {}]   ;;  %s5436_s10 = inlined_call_operand.vmem [shape: f32[32,1], index: 10, kind: input, shape index: {}]   ;;  %s5437_s11 = inlined_call_operand.vmem [shape: f32[2,32,16], index: 11, kind: output, shape index: {}]  }
   0x1 LB: > { %s3897_s18 = sadd.s32 4294967295, %s4713_s17   ;;  %p3901_p0 = scmp.ge.s32.totalorder %s4713_s17, 1  ;;  %s4713_s17 = sphi %s4778_s17, %s21_s17  }
   0x2   : > { %p337_p1 = scmp.lt.s32.totalorder %s4713_s17, 3 }
   0x4   : > { %p338_p2 = pnand %p3901_p0, %p337_p1 }
   0x5   : > { %p377_p3 = scmp.lt.s32.totalorder (!%p338_p2), %s3897_s18, 1  ;;  %s4716_s20 = smov (!%p338_p2), 127  }
   0x6   : > { %341 = sbr.rel (%p338_p2) target bundleno = 1893 (0x765), region = 64  ;;  %s4717_s21 = smov (!%p338_p2), 1  }
   0xb   : > { %s5443_s18 = smov (!%p377_p3, %s3897_s18), 1  ;;  %vm404_vm0 = vcmask 130048   ;;  %v392_v16 = vld [vmem:[%s5427_s1] sm:$0xff]  ;;  %vm441_vm1 = vcmask 261120   ;;  %v393_v23 = vld [vmem:[%s5427_s1 + $0x8] sm:$0xff]  ;;  %v394_v24 = vld [vmem:[%s5427_s1 + $0x10] sm:$0xff] }
   0xc   : > { %s3988_s19 = sshll.u32 %s5443_s18, 5  ;;  %v443_v17 = vsel %vm441_vm1, %v392_v16, 0  ;;  %v446_v25 = vsel %vm441_vm1, %v393_v23, 0  ;;  %v449_v26 = vsel %vm441_vm1, %v394_v24, 0  ;;  %v395_v27 = vld [vmem:[%s5427_s1 + $0x18] sm:$0xff]  ;;  %vm1850_vm2 = vcmask 7168  }
   0xd   : > { %s4794_s22 = scalar_lea.vmem %s5426_s0, %s3988_s19  ;;  %v4832_v18 = vand.u32 4294901760, %v443_v17  ;;  %v4857_v28 = vand.u32 4294901760, %v446_v25  ;;  %v4859_v29 = vand.u32 4294901760, %v449_v26  ;;  %v452_v30 = vsel %vm441_vm1, %v395_v27, 0  ;;  %vm3920_vm3 = vmneg %vm1850_vm2  ;;  %s386_s12 = scalar_lea.vmem %s5437_s11, %s3988_s19 }
   0xe   : > { %v4797_v0 = vld [vmem:[%s4794_s22 + $0x18] sm:$0xff]  ;;  %v4800_v1 = vld [vmem:[%s4794_s22 + $0x8] sm:$0xff]  ;;  %v4803_v2 = vld [vmem:[%s4794_s22 + $0x10] sm:$0xff]  ;;  %v4868_v35 = vand.u32 4294901760, %v452_v30  ;;  %vm1867_vm4 = vcmask 121856  }
   0xf   : > { %v414_v3 = vsel %vm404_vm0, %v4797_v0, 0.0  ;;  %v408_v4 = vsel %vm404_vm0, %v4800_v1, 0.0  ;;  %v4810_v5 = vld [vmem:[%s4794_s22] sm:$0xff]  ;;  %v411_v6 = vsel %vm404_vm0, %v4803_v2, 0.0  ;;  %v424_v8 = vmul.f32 %v4797_v0, %v4797_v0  ;;  %4228 = vmatprep.mubr.f32.mxu1 %v4832_v18  ;;  %vm5077_vm5 = vmpackc.low %vm3920_vm3, %vm3920_vm3 }
  0x10   : > { %415 = vadd.xlane.f32.xlu0 %v414_v3  ;;  %409 = vadd.xlane.f32.xlu1 %v408_v4  ;;  %v405_v7 = vsel %vm404_vm0, %v4810_v5, 0.0  ;;  %v423_v9 = vmul.f32 %v4803_v2, %v4803_v2  ;;  %v422_v12 = vmul.f32 %v4800_v1, %v4800_v1  ;;  %v421_v13 = vmul.f32 %v4810_v5, %v4810_v5  ;;  %vm5081_vm6 = vmpackc.low %vm1867_vm4, %vm1867_vm4 }
  0x11   : > { %v434_v10 = vsel %vm404_vm0, %v424_v8, 0.0  ;;  %v4835_v19 = vsub.f32 %v443_v17, %v4832_v18  ;;  %v4863_v31 = vsub.f32 %v446_v25, %v4857_v28  ;;  %v4866_v34 = vsub.f32 %v449_v26, %v4859_v29 }
  0x12   : > { %v431_v11 = vsel %vm404_vm0, %v423_v9, 0.0  ;;  %v428_v14 = vsel %vm404_vm0, %v422_v12, 0.0  ;;  %v425_v15 = vsel %vm404_vm0, %v421_v13, 0.0  ;;  %v4881_v44 = vsub.f32 %v452_v30, %v4868_v35 }
  0x13   : > { %v4839_v20 = vand.u32 4294901760, %v4835_v19  ;;  %v4875_v40 = vand.u32 4294901760, %v4863_v31  ;;  %v4878_v43 = vand.u32 4294901760, %v4866_v34 }
  0x14   : > { %412 = vadd.xlane.f32.xlu0 %v411_v6  ;;  %406 = vadd.xlane.f32.xlu1 %v405_v7  ;;  %v4896_v54 = vand.u32 4294901760, %v4881_v44 }
  0x15   : > { %v526_v21 = vsub.f32 %v4835_v19, %v4839_v20  ;;  %v536_v52 = vsub.f32 %v4863_v31, %v4875_v40  ;;  %v546_v53 = vsub.f32 %v4866_v34, %v4878_v43 }
  0x16   : > { %v556_v3 = vsub.f32 %v4881_v44, %v4896_v54 }
  0x17   : > { %v4843_v22 = vand.u32 4294901760, %v526_v21  ;;  %v4903_v60 = vand.u32 4294901760, %v536_v52  ;;  %v4908_v63 = vand.u32 4294901760, %v546_v53 }
  0x18   : > { %435 = vadd.xlane.f32.xlu0 %v434_v10  ;;  %432 = vadd.xlane.f32.xlu1 %v431_v11  ;;  %v4917_v9 = vand.u32 4294901760, %v556_v3 }
  0x19   : > { %4214 = vmatprep.mubr.f32.mxu0 %v4843_v22 }
  0x1c   : > { %429 = vadd.xlane.f32.xlu0 %v428_v14  ;;  %426 = vadd.xlane.f32.xlu1 %v425_v15 }
  0x99   : > { %v416_v32 = vpop.xlane.xlu0 %415  ;;  %v410_v33 = vpop.xlane.xlu1 %409 }
  0x9a   : > { %v420_v36 = vmul.f32 0.0625, %v416_v32  ;;  %v418_v37 = vmul.f32 0.0625, %v410_v33 }
  0x9c   : > { %v4870_v38 = vand.u32 4294901760, %v420_v36  ;;  %v4872_v39 = vand.u32 4294901760, %v418_v37 }
  0x9d   : > { %v413_v41 = vpop.xlane.xlu0 %412  ;;  %v407_v42 = vpop.xlane.xlu1 %406 }
  0x9e   : > { %v589_v45 = vsub.f32 %v420_v36, %v4870_v38  ;;  %v603_v46 = vsub.f32 %v418_v37, %v4872_v39  ;;  %v419_v47 = vmul.f32 0.0625, %v413_v41  ;;  %v417_v48 = vmul.f32 0.0625, %v407_v42  ;;  %4206 = vmatprep.subr.mxu0 %v4870_v38 }
  0x9f   : > { %4207 = vmatpush3.msra.mxu0 %v4870_v38 }
  0xa0   : > { %v4887_v49 = vand.u32 4294901760, %v419_v47  ;;  %v4889_v50 = vand.u32 4294901760, %v417_v48  ;;  %v590_v51 = vand.u32 4294901760, %v589_v45  ;;  %v604_v58 = vand.u32 4294901760, %v603_v46 }
  0xa1   : > { %v436_v12 = vpop.xlane.xlu0 %435  ;;  %v433_v14 = vpop.xlane.xlu1 %432 }
  0xa2   : > { %v596_v55 = vsub.f32 %v419_v47, %v4887_v49  ;;  %v610_v56 = vsub.f32 %v417_v48, %v4889_v50  ;;  %4208 = vmatprep.subr.mxu0 %v4887_v49  ;;  %v591_v57 = vsub.f32 %v589_v45, %v590_v51  ;;  %v605_v6 = vsub.f32 %v603_v46, %v604_v58 }
  0xa3   : > { %4209 = vmatpush3.msra.mxu0 %v4887_v49  ;;  %v440_v13 = vmul.f32 0.0625, %v436_v12  ;;  %v439_v15 = vmul.f32 0.0625, %v433_v14 }
  0xa4   : > { %4210 = vmatprep.subr.mxu0 %v4872_v39  ;;  %v592_v59 = vand.u32 4294901760, %v591_v57  ;;  %v597_v61 = vand.u32 4294901760, %v596_v55  ;;  %v4905_v62 = vand.u32 4294901760, %v610_v56  ;;  %v606_v10 = vand.u32 4294901760, %v605_v6 }
  0xa5   : > { %4211 = vmatpush3.msra.mxu0 %v4872_v39  ;;  %v430_v16 = vpop.xlane.xlu0 %429  ;;  %v4929_v17 = vand.u32 4294901760, %v440_v13  ;;  %v427_v23 = vpop.xlane.xlu1 %426  ;;  %v4935_v24 = vand.u32 4294901760, %v439_v15 }
  0xa6   : > { %4212 = vmatprep.subr.mxu0 %v4889_v50  ;;  %4220 = vmatprep.subr.mxu1 %v592_v59  ;;  %v598_v4 = vsub.f32 %v596_v55, %v597_v61  ;;  %v612_v8 = vsub.f32 %v610_v56, %v4905_v62  ;;  %v438_v21 = vmul.f32 0.0625, %v430_v16  ;;  %v437_v26 = vmul.f32 0.0625, %v427_v23 }
  0xa7   : > { %4213 = vmatpush3.msra.mxu0 %v4889_v50  ;;  %4221 = vmatpush3.msra.mxu1 %v592_v59  ;;  %v1207_v25 = vsub.f32 %v440_v13, %v4929_v17  ;;  %v1214_v30 = vsub.f32 %v439_v15, %v4935_v24 }
  0xa8   : > { %4234 = vmatprep.subr.mxu0 %v589_v45  ;;  %4215 = vmatmul.mubr.f32.vlgmr.msra.gmra.mxu0 %v4903_v60  ;;  %v599_v7 = vand.u32 4294901760, %v598_v4  ;;  %v613_v11 = vand.u32 4294901760, %v612_v8  ;;  %v4944_v27 = vand.u32 4294901760, %v438_v21  ;;  %v4953_v33 = vand.u32 4294901760, %v437_v26 }
  0xa9   : > { %4235 = vmatpush3.msra.mxu0 %v589_v45  ;;  %4217 = vmatprep.mubr.f32.mxu0 %v4908_v63  ;;  %v1208_v32 = vand.u32 4294901760, %v1207_v25  ;;  %v1215_v37 = vand.u32 4294901760, %v1214_v30 }
  0xaa   : > { %4222 = vmatprep.subr.mxu1 %v599_v7  ;;  %4236 = vmatprep.subr.mxu0 %v596_v55  ;;  %v1221_v36 = vsub.f32 %v438_v21, %v4944_v27  ;;  %v1228_v41 = vsub.f32 %v437_v26, %v4953_v33 }
  0xab   : > { %4223 = vmatpush3.msra.mxu1 %v599_v7  ;;  %4237 = vmatpush3.msra.mxu0 %v596_v55  ;;  %v1216_v45 = vsub.f32 %v1214_v30, %v1215_v37 }
  0xac   : > { %4224 = vmatprep.subr.mxu1 %v606_v10  ;;  %4238 = vmatprep.subr.mxu0 %v603_v46  ;;  %v1222_v42 = vand.u32 4294901760, %v1221_v36  ;;  %v1229_v47 = vand.u32 4294901760, %v1228_v41 }
  0xad   : > { %4218 = vmatmul.mubr.f32.gmra.mxu0 %v4917_v9  ;;  %4225 = vmatpush3.msra.mxu1 %v606_v10  ;;  %v1217_v48 = vand.u32 4294901760, %v1216_v45 }
  0xae   : > { %4239 = vmatpush3.msra.mxu0 %v603_v46  ;;  %4226 = vmatprep.subr.mxu1 %v613_v11 }
  0xaf   : > { %4240 = vmatprep.subr.mxu0 %v610_v56  ;;  %4227 = vmatpush3.msra.mxu1 %v613_v11 }
  0xb0   : > { %4241 = vmatpush3.msra.mxu0 %v610_v56  ;;  %4229 = vmatmul.mubr.f32.vlgmr.msra.gmra.mxu1 %v4857_v28 }
  0xb1   : > { %4242 = vmatprep.mubr.f32.mxu0 %v4835_v19  ;;  %4248 = vmatprep.subr.mxu1 %v4870_v38 }
  0xb2   : > { %4262 = vmatprep.subr.mxu0 %v590_v51  ;;  %4243 = vmatmul.mubr.f32.vlgmr.msra.gmra.mxu0 %v4863_v31 }
  0xb3   : > { %4249 = vmatpush3.msra.mxu1 %v4870_v38  ;;  %4263 = vmatpush3.msra.mxu0 %v590_v51 }
  0xb4   : > { %4250 = vmatprep.subr.mxu1 %v4887_v49  ;;  %4264 = vmatprep.subr.mxu0 %v597_v61 }
  0xb5   : > { %4231 = vmatprep.mubr.f32.mxu1 %v4859_v29  ;;  %4251 = vmatpush3.msra.mxu1 %v4887_v49 }
  0xb6   : > { %4265 = vmatpush3.msra.mxu0 %v597_v61  ;;  %4232 = vmatmul.mubr.f32.gmra.mxu1 %v4868_v35 }
  0xb7   : > { %4245 = vmatprep.mubr.f32.mxu0 %v4866_v34  ;;  %4252 = vmatprep.subr.mxu1 %v4872_v39 }
  0xb8   : > { %4266 = vmatprep.subr.mxu0 %v604_v58  ;;  %4246 = vmatmul.mubr.f32.gmra.mxu0 %v4881_v44 }
  0xb9   : > { %4253 = vmatpush3.msra.mxu1 %v4872_v39  ;;  %4267 = vmatpush3.msra.mxu0 %v604_v58 }
  0xba   : > { %4254 = vmatprep.subr.mxu1 %v4889_v50  ;;  %4268 = vmatprep.subr.mxu0 %v4905_v62 }
  0xbb   : > { %4255 = vmatpush3.msra.mxu1 %v4889_v50  ;;  %4256 = vmatprep.mubr.f32.mxu1 %v4839_v20 }
  0xbc   : > { %4269 = vmatpush3.msra.mxu0 %v4905_v62  ;;  %4257 = vmatmul.mubr.f32.vlgmr.msra.gmra.mxu1 %v4875_v40 }
  0xbd   : > { %4270 = vmatprep.mubr.f32.mxu0 %v4832_v18  ;;  %4276 = vmatprep.subr.mxu1 %v4870_v38 }
  0xbe   : > { %4290 = vmatprep.subr.mxu0 %v4929_v17  ;;  %4271 = vmatmul.mubr.f32.vlgmr.msra.gmra.mxu0 %v4857_v28 }
  0xbf   : > { %4277 = vmatpush3.msra.mxu1 %v4870_v38  ;;  %4291 = vmatpush3.msra.mxu0 %v4929_v17  ;;  %v1209_v38 = vsub.f32 %v1207_v25, %v1208_v32 }
  0xc0   : > { %4278 = vmatprep.subr.mxu1 %v4887_v49  ;;  %4292 = vmatprep.subr.mxu0 %v4935_v24 }
  0xc1   : > { %4259 = vmatprep.mubr.f32.mxu1 %v4878_v43  ;;  %4279 = vmatpush3.msra.mxu1 %v4887_v49  ;;  %v1210_v46 = vand.u32 4294901760, %v1209_v38  ;;  %v1230_v49 = vsub.f32 %v1228_v41, %v1229_v47 }
  0xc2   : > { %4293 = vmatpush3.msra.mxu0 %v4935_v24  ;;  %4260 = vmatmul.mubr.f32.gmra.mxu1 %v4896_v54 }
  0xc3   : > { %4273 = vmatprep.mubr.f32.mxu0 %v4859_v29  ;;  %4280 = vmatprep.subr.mxu1 %v4872_v39 }
  0xc4   : > { %4294 = vmatprep.subr.mxu0 %v4944_v27  ;;  %4274 = vmatmul.mubr.f32.gmra.mxu0 %v4868_v35 }
  0xc5   : > { %4281 = vmatpush3.msra.mxu1 %v4872_v39  ;;  %4295 = vmatpush3.msra.mxu0 %v4944_v27  ;;  %v1223_v39 = vsub.f32 %v1221_v36, %v1222_v42 }
  0xc6   : > { %4282 = vmatprep.subr.mxu1 %v4889_v50  ;;  %4296 = vmatprep.subr.mxu0 %v4953_v33 }
  0xc7   : > { %4283 = vmatpush3.msra.mxu1 %v4889_v50  ;;  %4284 = vmatprep.mubr.f32.mxu1 %v4832_v18  ;;  %v1224_v50 = vand.u32 4294901760, %v1223_v39 }
  0xc8   : > { %4297 = vmatpush3.msra.mxu0 %v4953_v33  ;;  %4285 = vmatmul.mubr.f32.vlgmr.msra.gmra.mxu1 %v4857_v28 }
  0xc9   : > { %4298 = vmatprep.mubr.f32.mxu0 %v4843_v22  ;;  %4304 = vmatprep.subr.mxu1 %v1210_v46  ;;  %v1231_v22 = vand.u32 4294901760, %v1230_v49 }
  0xca   : > { %4318 = vmatprep.subr.mxu0 %v1207_v25  ;;  %4299 = vmatmul.mubr.f32.vlgmr.msra.gmra.mxu0 %v4903_v60 }
  0xcb   : > { %4305 = vmatpush3.msra.mxu1 %v1210_v46  ;;  %4319 = vmatpush3.msra.mxu0 %v1207_v25 }
  0xcc   : > { %4306 = vmatprep.subr.mxu1 %v1217_v48  ;;  %4320 = vmatprep.subr.mxu0 %v1214_v30 }
  0xcd   : > { %4287 = vmatprep.mubr.f32.mxu1 %v4859_v29  ;;  %4307 = vmatpush3.msra.mxu1 %v1217_v48 }
  0xce   : > { %4321 = vmatpush3.msra.mxu0 %v1214_v30  ;;  %4288 = vmatmul.mubr.f32.gmra.mxu1 %v4868_v35 }
  0xcf   : > { %4301 = vmatprep.mubr.f32.mxu0 %v4908_v63  ;;  %4308 = vmatprep.subr.mxu1 %v1224_v50 }
  0xd0   : > { %4322 = vmatprep.subr.mxu0 %v1221_v36  ;;  %4302 = vmatmul.mubr.f32.gmra.mxu0 %v4917_v9 }
  0xd1   : > { %4309 = vmatpush3.msra.mxu1 %v1224_v50  ;;  %4323 = vmatpush3.msra.mxu0 %v1221_v36 }
  0xd2   : > { %4310 = vmatprep.subr.mxu1 %v1231_v22  ;;  %4324 = vmatprep.subr.mxu0 %v1228_v41 }
  0xd3   : > { %4311 = vmatpush3.msra.mxu1 %v1231_v22  ;;  %4312 = vmatprep.mubr.f32.mxu1 %v4832_v18 }
  0xd4   : > { %4325 = vmatpush3.msra.mxu0 %v1228_v41  ;;  %4313 = vmatmul.mubr.f32.vlgmr.msra.gmra.mxu1 %v4857_v28 }
  0xd5   : > { %4326 = vmatprep.mubr.f32.mxu0 %v4835_v19  ;;  %4332 = vmatprep.subr.mxu1 %v4929_v17  ;;  %v4715_v19 = vmov 0  }
  0xd6   : > { %4346 = vmatprep.subr.mxu0 %v1208_v32  ;;  %4327 = vmatmul.mubr.f32.vlgmr.msra.gmra.mxu0 %v4863_v31 }
  0xd7   : > { %4333 = vmatpush3.msra.mxu1 %v4929_v17  ;;  %4347 = vmatpush3.msra.mxu0 %v1208_v32 }
  0xd8   : > { %4334 = vmatprep.subr.mxu1 %v4935_v24  ;;  %4348 = vmatprep.subr.mxu0 %v1215_v37 }
  0xd9   : > { %4315 = vmatprep.mubr.f32.mxu1 %v4859_v29  ;;  %4335 = vmatpush3.msra.mxu1 %v4935_v24 }
  0xda   : > { %4349 = vmatpush3.msra.mxu0 %v1215_v37  ;;  %4316 = vmatmul.mubr.f32.gmra.mxu1 %v4868_v35 }
  0xdb   : > { %4336 = vmatprep.subr.mxu1 %v4944_v27  ;;  %4350 = vmatprep.subr.mxu0 %v1222_v42 }
  0xdc   : > { %4329 = vmatprep.mubr.f32.mxu0 %v4866_v34  ;;  %4337 = vmatpush3.msra.mxu1 %v4944_v27 }
  0xdd   : > { %4351 = vmatpush3.msra.mxu0 %v1222_v42  ;;  %4338 = vmatprep.subr.mxu1 %v4953_v33 }
  0xde   : > { %4330 = vmatmul.mubr.f32.gmra.mxu0 %v4881_v44  ;;  %4352 = vmatprep.subr.mxu0 %v1229_v47 }
  0xdf   : > { %4339 = vmatpush3.msra.mxu1 %v4953_v33  ;;  %4340 = vmatprep.mubr.f32.mxu1 %v4839_v20  ;;  %v398_v20 = vld [vmem:[%s5428_s2 + $0x10] sm:$0xff] }
  0xe0   : > { %4353 = vmatpush3.msra.mxu0 %v1229_v47  ;;  %4341 = vmatmul.mubr.f32.vlgmr.msra.gmra.mxu1 %v4875_v40 }
  0xe1   : > { %4360 = vmatprep.subr.mxu1 %v4929_v17  ;;  %4354 = vmatprep.mubr.f32.mxu0 %v4832_v18 }
  0xe2   : > { %4361 = vmatpush3.msra.mxu1 %v4929_v17  ;;  %4355 = vmatmul.mubr.f32.vlgmr.msra.gmra.mxu0 %v4857_v28 }
  0xe3   : > { %4362 = vmatprep.subr.mxu1 %v4935_v24  ;;  %4343 = vmatprep.mubr.f32.mxu1 %v4878_v43 }
  0xe4   : > { %4363 = vmatpush3.msra.mxu1 %v4935_v24  ;;  %4357 = vmatprep.mubr.f32.mxu0 %v4859_v29 }
  0xe5   : > { %4344 = vmatmul.mubr.f32.gmra.mxu1 %v4896_v54  ;;  %4364 = vmatprep.subr.mxu1 %v4944_v27 }
  0xe6   : > { %4365 = vmatpush3.msra.mxu1 %v4944_v27  ;;  %4358 = vmatmul.mubr.f32.gmra.mxu0 %v4868_v35 }
  0xe7   : > { %4366 = vmatprep.subr.mxu1 %v4953_v33  ;;  %4368 = vmatprep.mubr.f32.mxu1 %v4832_v18  ;;  %v399_v18 = vld [vmem:[%s5428_s2 + $0x18] sm:$0xff] }
  0xe8   : > { %4367 = vmatpush3.msra.mxu1 %v4953_v33  ;;  %4601 = vset.pattern.permute.xlu1 %v4715_v19 }
  0xe9   : > { %4369 = vmatmul.mubr.f32.vlgmr.msra.gmra.mxu1 %v4857_v28  ;;  %4602 = vset.pattern.permute.xlu0 %v4715_v19  ;;  %v402_v28 = vld [vmem:[%s5429_s3 + $0x10] sm:$0xff] }
  0xea   : > { %4371 = vmatprep.mubr.f32.mxu1 %v4859_v29  ;;  %1766 = vperm.xlu1 %4601, %v398_v20   ;;  %v403_v29 = vld [vmem:[%s5429_s3 + $0x18] sm:$0xff] }
  0xeb   : > { %1795 = vperm.xlu0 %4602, %v403_v29  }
  0xed   : > { %4372 = vmatmul.mubr.f32.gmra.mxu1 %v4868_v35 }
  0xee   : > { %1771 = vperm.xlu1 %4601, %v399_v18  }
  0xf2   : > { %1790 = vperm.xlu1 %4601, %v402_v28  }
 0x168   : > { %v4216_v31 = vpop.f32.mrf.mxu0 }
 0x16a   : > { %v529_v34 = vpop.f32.mrf.mxu0 }
 0x16d   : > { %v4219_v35 = vpop.f32.mrf.mxu0 }
 0x16f   : > { %v549_v40 = vpop.f32.mrf.mxu0 }
 0x170   : > { %v4230_v43 = vpop.f32.mrf.mxu1 }
 0x171   : > { %v657_v58 = vadd.f32 %v4230_v43, %v4216_v31 }
 0x172   : > { %v650_v44 = vpop.f32.mrf.mxu1  ;;  %v4244_v51 = vpop.f32.mrf.mxu0 }
 0x173   : > { %v651_v61 = vadd.f32 %v650_v44, %v529_v34  ;;  %v756_v63 = vadd.f32 %v4244_v51, %v657_v58 }
 0x174   : > { %v748_v52 = vpop.f32.mrf.mxu0 }
 0x175   : > { %v749_v6 = vadd.f32 %v748_v52, %v651_v61 }
 0x176   : > { %v4233_v53 = vpop.f32.mrf.mxu1 }
 0x177   : > { %v669_v4 = vadd.f32 %v4233_v53, %v4219_v35 }
 0x178   : > { %v662_v54 = vpop.f32.mrf.mxu1  ;;  %v4247_v55 = vpop.f32.mrf.mxu0 }
 0x179   : > { %v663_v10 = vadd.f32 %v662_v54, %v549_v40  ;;  %v770_v13 = vadd.f32 %v4247_v55, %v669_v4 }
 0x17a   : > { %v762_v56 = vpop.f32.mrf.mxu0 }
 0x17b   : > { %v763_v16 = vadd.f32 %v762_v56, %v663_v10 }
 0x17c   : > { %v4258_v57 = vpop.f32.mrf.mxu1 }
 0x17d   : > { %v855_v7 = vadd.f32 %v4258_v57, %v756_v63 }
 0x17e   : > { %v846_v59 = vpop.f32.mrf.mxu1  ;;  %v4272_v60 = vpop.f32.mrf.mxu0 }
 0x17f   : > { %v847_v11 = vadd.f32 %v846_v59, %v749_v6  ;;  %v960_v14 = vadd.f32 %v4272_v60, %v855_v7 }
 0x180   : > { %v953_v62 = vpop.f32.mrf.mxu0 }
 0x181   : > { %v954_v21 = vadd.f32 %v953_v62, %v847_v11 }
 0x182   : > { %v4261_v3 = vpop.f32.mrf.mxu1 }
 0x183   : > { %v871_v17 = vadd.f32 %v4261_v3, %v770_v13 }
 0x184   : > { %v862_v8 = vpop.f32.mrf.mxu1  ;;  %v4275_v9 = vpop.f32.mrf.mxu0 }
 0x185   : > { %v863_v26 = vadd.f32 %v862_v8, %v763_v16  ;;  %v972_v33 = vadd.f32 %v4275_v9, %v871_v17 }
 0x186   : > { %v965_v12 = vpop.f32.mrf.mxu0 }
 0x187   : > { %v966_v37 = vadd.f32 %v965_v12, %v863_v26 }
 0x188   : > { %v4286_v15 = vpop.f32.mrf.mxu1 }
 0x189   : > { %v1053_v23 = vadd.f32 %v4286_v15, %v960_v14 }
 0x18a   : > { %v1046_v24 = vpop.f32.mrf.mxu1  ;;  %v4300_v25 = vpop.f32.mrf.mxu0 }
 0x18b   : > { %v1069_v27 = vmul.f32 0.25, %v1053_v23  ;;  %v1047_v30 = vadd.f32 %v1046_v24, %v954_v21 }
 0x18c   : > { %v1147_v32 = vpop.f32.mrf.mxu0 }
 0x18d   : > { %1705 = vperm.xlu1 %4601, %v1069_v27   ;;  %v1068_v38 = vmul.f32 0.25, %v1047_v30  ;;  %v1691_v10 = vmul.f32 %v1069_v27, %v1069_v27 }
 0x18e   : > { %v4289_v36 = vpop.f32.mrf.mxu1 }
 0x18f   : > { %v1065_v41 = vadd.f32 %v4289_v36, %v972_v33  ;;  %v1690_v14 = vmul.f32 %v1068_v38, %v1068_v38 }
 0x190   : > { %v1058_v42 = vpop.f32.mrf.mxu1  ;;  %v4303_v45 = vpop.f32.mrf.mxu0 }
 0x191   : > { %v1059_v46 = vadd.f32 %v1058_v42, %v966_v37  ;;  %1700 = vperm.xlu1 %4601, %v1068_v38   ;;  %v1071_v39 = vmul.f32 0.25, %v1065_v41 }
 0x192   : > { %v1167_v47 = vpop.f32.mrf.mxu0 }
 0x193   : > { %v1070_v48 = vmul.f32 0.25, %v1059_v46  ;;  %v1693_v24 = vmul.f32 %v1071_v39, %v1071_v39 }
 0x194   : > { %v4314_v49 = vpop.f32.mrf.mxu1 }
 0x195   : > { %1710 = vperm.xlu0 %4602, %v1070_v48   ;;  %1715 = vperm.xlu1 %4601, %v1071_v39   ;;  %v1275_v28 = vadd.f32 %v4314_v49, %v4300_v25  ;;  %v1692_v36 = vmul.f32 %v1070_v48, %v1070_v48  ;;  %v397_v39 = vld [vmem:[%s5428_s2 + $0x8] sm:$0xff] }
 0x196   : > { %v1268_v50 = vpop.f32.mrf.mxu1  ;;  %v4328_v22 = vpop.f32.mrf.mxu0  ;;  %v401_v49 = vld [vmem:[%s5429_s3 + $0x8] sm:$0xff] }
 0x197   : > { %v1269_v31 = vadd.f32 %v1268_v50, %v1147_v32  ;;  %v1374_v40 = vadd.f32 %v4328_v22, %v1275_v28  ;;  %v396_v22 = vld [vmem:[%s5428_s2] sm:$0xff] }
 0x198   : > { %v1366_v20 = vpop.f32.mrf.mxu0 }
 0x199   : > { %v1367_v52 = vadd.f32 %v1366_v20, %v1269_v31  ;;  %v4643_v20 = vld [vmem:[%s5430_s4 + $0x10] sm:$0xff]  }
 0x19a   : > { %v4317_v19 = vpop.f32.mrf.mxu1  ;;  %4378 = vmatprep.mubr.msk.bf16.mxu0 %vm441_vm1, %v4643_v20 }
 0x19b   : > { %v1287_v43 = vadd.f32 %v4317_v19, %v4303_v45  ;;  %v400_v19 = vld [vmem:[%s5429_s3] sm:$0xff] }
 0x19c   : > { %v1280_v18 = vpop.f32.mrf.mxu1 }
 0x19d   : > { %v1281_v53 = vadd.f32 %v1280_v18, %v1167_v47  ;;  %v1767_v18 = vpop.permute.xlu1 %1766 }
 0x19e   : > { %v4331_v29 = vpop.f32.mrf.mxu0 }
 0x19f   : > { %v1388_v57 = vadd.f32 %v4331_v29, %v1287_v43 }
 0x1a0   : > { %v1380_v34 = vpop.f32.mrf.mxu0  ;;  %v4342_v35 = vpop.f32.mrf.mxu1 }
 0x1a1   : > { %v1473_v54 = vadd.f32 %v4342_v35, %v1374_v40  ;;  %v1381_v61 = vadd.f32 %v1380_v34, %v1281_v53  ;;  %v1772_v28 = vpop.permute.xlu1 %1771  ;;  %v1796_v34 = vpop.permute.xlu0 %1795 }
 0x1a2   : > { %v1464_v44 = vpop.f32.mrf.mxu1  ;;  %v4356_v51 = vpop.f32.mrf.mxu0 }
 0x1a3   : > { %v1465_v58 = vadd.f32 %v1464_v44, %v1367_v52  ;;  %v1578_v62 = vadd.f32 %v4356_v51, %v1473_v54 }
 0x1a4   : > { %v1571_v55 = vpop.f32.mrf.mxu0 }
 0x1a5   : > { %v4345_v56 = vpop.f32.mrf.mxu1  ;;  %v1572_v4 = vadd.f32 %v1571_v55, %v1465_v58  ;;  %v1791_v29 = vpop.permute.xlu1 %1790 }
 0x1a6   : > { %v4359_v60 = vpop.f32.mrf.mxu0  ;;  %v1489_v63 = vadd.f32 %v4345_v56, %v1388_v57 }
 0x1a7   : > { %v1480_v59 = vpop.f32.mrf.mxu1 }
 0x1a8   : > { %v1481_v6 = vadd.f32 %v1480_v59, %v1381_v61  ;;  %v1583_v8 = vpop.f32.mrf.mxu0  ;;  %v1590_v11 = vadd.f32 %v4359_v60, %v1489_v63 }
 0x1a9   : > { %v4370_v3 = vpop.f32.mrf.mxu1 }
 0x1aa   : > { %v1671_v7 = vadd.f32 %v4370_v3, %v1578_v62  ;;  %v1584_v16 = vadd.f32 %v1583_v8, %v1481_v6 }
 0x1ab   : > { %v1664_v9 = vpop.f32.mrf.mxu1 }
 0x1ac   : > { %v1687_v12 = vmul.f32 0.25, %v1671_v7  ;;  %v1665_v13 = vadd.f32 %v1664_v9, %v1572_v4 }
 0x1ad   : > { %v4373_v15 = vpop.f32.mrf.mxu1 }
 0x1ae   : > { %v1695_v17 = vsub.f32 %v1687_v12, %v1691_v10  ;;  %v1686_v21 = vmul.f32 0.25, %v1665_v13  ;;  %v1683_v23 = vadd.f32 %v4373_v15, %v1590_v11 }
 0x1af   : > { %v1676_v25 = vpop.f32.mrf.mxu1 }
 0x1b0   : > { %v1723_v26 = vadd.f32 1e-06, %v1695_v17  ;;  %v1694_v30 = vsub.f32 %v1686_v21, %v1690_v14  ;;  %v1689_v32 = vmul.f32 0.25, %v1683_v23  ;;  %v1677_v33 = vadd.f32 %v1676_v25, %v1584_v16 }
 0x1b2   : > { %4655 = vrsqrt.f32 %v1723_v26  ;;  %v1722_v37 = vadd.f32 1e-06, %v1694_v30  ;;  %v1697_v41 = vsub.f32 %v1689_v32, %v1693_v24  ;;  %v1688_v27 = vmul.f32 0.25, %v1677_v33 }
 0x1b4   : > { %4657 = vrsqrt.f32 %v1722_v37  ;;  %v1725_v42 = vadd.f32 1e-06, %v1697_v41  ;;  %v1696_v45 = vsub.f32 %v1688_v27, %v1692_v36  ;;  %v4645_v36 = vld [vmem:[%s5430_s4] sm:$0xff]  }
 0x1b5   : > { %4386 = vmatprep.mubr.msk.bf16.mxu1 %vm441_vm1, %v4645_v36 }
 0x1b6   : > { %4659 = vrsqrt.f32 %v1725_v42  ;;  %v1724_v38 = vadd.f32 1e-06, %v1696_v45 }
 0x1b8   : > { %4661 = vrsqrt.f32 %v1724_v38 }
 0x1bf   : > { %v4656_v46 = vpop.eup %4655 }
 0x1c0   : > { %1737 = vperm.xlu0 %4602, %v4656_v46  }
 0x1c1   : > { %v4658_v47 = vpop.eup %4657 }
 0x1c2   : > { %1732 = vperm.xlu1 %4601, %v4658_v47  }
 0x1c3   : > { %v4660_v48 = vpop.eup %4659 }
 0x1c4   : > { %1761 = vperm.xlu0 %4602, %v397_v39   ;;  %v1832_v39 = vld [vmem:[%s5431_s5 + $0x10] sm:$0xff] }
 0x1c5   : > { %v4662_v50 = vpop.eup %4661 }
 0x1c6   : > { %1747 = vperm.xlu1 %4601, %v4660_v48   ;;  %v1833_v48 = vld [vmem:[%s5431_s5 + $0x18] sm:$0xff] }
 0x1c8   : > { %1785 = vperm.xlu0 %4602, %v401_v49   ;;  %v4644_v49 = vld [vmem:[%s5430_s4 + $0x18] sm:$0xff]  }
 0x1ca   : > { %1742 = vperm.xlu1 %4601, %v4662_v50   ;;  %v4646_v50 = vld [vmem:[%s5430_s4 + $0x20] sm:$0xff]  }
 0x1ce   : > { %1756 = vperm.xlu1 %4601, %v396_v22   ;;  %v1830_v22 = vld [vmem:[%s5431_s5] sm:$0xff] }
 0x1d2   : > { %1780 = vperm.xlu1 %4601, %v400_v19   ;;  %v1831_v19 = vld [vmem:[%s5431_s5 + $0x8] sm:$0xff] }
 0x208   : > { %v1706_v31 = vpop.permute.xlu1 %1705 }
 0x209   : > { %v1719_v52 = vsub.f32 %v4800_v1, %v1706_v31 }
 0x20c   : > { %v1701_v35 = vpop.permute.xlu1 %1700 }
 0x20d   : > { %v1718_v6 = vsub.f32 %v4810_v5, %v1701_v35 }
 0x210   : > { %v1711_v40 = vpop.permute.xlu0 %1710  ;;  %v1716_v43 = vpop.permute.xlu1 %1715 }
 0x211   : > { %v1721_v54 = vsub.f32 %v4797_v0, %v1716_v43  ;;  %v1720_v60 = vsub.f32 %v4803_v2, %v1711_v40 }
 0x23b   : > { %v1738_v44 = vpop.permute.xlu0 %1737 }
 0x23c   : > { %v1751_v55 = vmul.f32 %v1738_v44, %v1719_v52 }
 0x23d   : > { %v1733_v51 = vpop.permute.xlu1 %1732 }
 0x23e   : > { %v1750_v10 = vmul.f32 %v1733_v51, %v1718_v6 }
 0x23f   : > { %v1762_v53 = vpop.permute.xlu0 %1761 }
 0x240   : > { %v1775_v57 = vmul.f32 %v1762_v53, %v1751_v55 }
 0x241   : > { %v1748_v56 = vpop.permute.xlu1 %1747 }
 0x242   : > { %v1753_v58 = vmul.f32 %v1748_v56, %v1721_v54 }
 0x243   : > { %v1786_v59 = vpop.permute.xlu0 %1785 }
 0x244   : > { %v1777_v61 = vmul.f32 %v1772_v28, %v1753_v58  ;;  %v1799_v62 = vadd.f32 %v1786_v59, %v1775_v57  ;;  %v4647_v59 = vld [vmem:[%s5430_s4 + $0x8] sm:$0xff]  }
 0x245   : > { %v1743_v63 = vpop.permute.xlu1 %1742 }
 0x246   : > { %v1801_v3 = vadd.f32 %v1796_v34, %v1777_v61  ;;  %v1752_v4 = vmul.f32 %v1743_v63, %v1720_v60  ;;  %v3907_v8 = vmul.f32 -1.442695, %v1799_v62  ;;  %v4648_v60 = vld [vmem:[%s5430_s4 + $0x28] sm:$0xff]  }
 0x248   : > { %v3909_v7 = vmul.f32 -1.442695, %v1801_v3  ;;  %v1776_v1 = vmul.f32 %v1767_v18, %v1752_v4 }
 0x249   : > { %v1757_v9 = vpop.permute.xlu1 %1756 }
 0x24a   : > { %4663 = vpow2.f32 %v3909_v7  ;;  %v1800_v0 = vadd.f32 %v1791_v29, %v1776_v1  ;;  %v1774_v12 = vmul.f32 %v1757_v9, %v1750_v10 }
 0x24b   : > { %4665 = vpow2.f32 %v3907_v8 }
 0x24c   : > { %v3908_v11 = vmul.f32 -1.442695, %v1800_v0 }
 0x24d   : > { %v1781_v13 = vpop.permute.xlu1 %1780 }
 0x24e   : > { %4667 = vpow2.f32 %v3908_v11  ;;  %v1798_v2 = vadd.f32 %v1781_v13, %v1774_v12 }
 0x250   : > { %v3906_v14 = vmul.f32 -1.442695, %v1798_v2 }
 0x252   : > { %4669 = vpow2.f32 %v3906_v14 }
 0x257   : > { %v4664_v15 = vpop.eup %4663 }
 0x258   : > { %v1817_v16 = vadd.f32 1.0, %v4664_v15  ;;  %v4666_v17 = vpop.eup %4665 }
 0x259   : > { %v1815_v5 = vadd.f32 1.0, %v4666_v17 }
 0x25a   : > { %4671 = vrcp.f32 %v1817_v16 }
 0x25b   : > { %v4668_v21 = vpop.eup %4667 }
 0x25c   : > { %v1816_v23 = vadd.f32 1.0, %v4668_v21 }
 0x25e   : > { %4673 = vrcp.f32 %v1816_v23 }
 0x25f   : > { %v4670_v24 = vpop.eup %4669  ;;  %4675 = vrcp.f32 %v1815_v5 }
 0x260   : > { %v1814_v25 = vadd.f32 1.0, %v4670_v24 }
 0x262   : > { %4677 = vrcp.f32 %v1814_v25 }
 0x267   : > { %v4672_v26 = vpop.eup %4671 }
 0x268   : > { %v1829_v32 = vmul.f32 %v4672_v26, %v1801_v3 }
 0x26b   : > { %v4674_v30 = vpop.eup %4673 }
 0x26c   : > { %v1828_v33 = vmul.f32 %v4674_v30, %v1800_v0  ;;  %v4676_v37 = vpop.eup %4675 }
 0x26d   : > { %v1827_v45 = vmul.f32 %v4676_v37, %v1799_v62 }
 0x26e   : > { %v4613_v41 = vpack.i.bf16 %v1829_v32, %v1828_v33  ;;  %v1884_v27 = vpack.c.bf16 %v1829_v32, %v1828_v33 }
 0x26f   : > { %v4678_v42 = vpop.eup %4677 }
 0x270   : > { %v1826_v38 = vmul.f32 %v4678_v42, %v1798_v2  ;;  %4614 = vrot.lane.b32.xlu0 %v4613_v41, %s4716_s20  ;;  %4604 = vrot.lane.b32.xlu1 %v4613_v41, %s4717_s21 }
 0x271   : > { %4374 = vmatprep.subr.bf16.mxu0 %v1884_v27 }
 0x272   : > { %4375 = vmatpush3.bf16.msra.mxu0 %v1884_v27  ;;  %v4618_v46 = vpack.i.bf16 %v1827_v45, %v1826_v38  ;;  %v1883_v47 = vpack.c.bf16 %v1827_v45, %v1826_v38 }
 0x274   : > { %4619 = vrot.lane.b32.xlu0 %v4618_v46, %s4716_s20  ;;  %4609 = vrot.lane.b32.xlu1 %v4618_v46, %s4717_s21 }
 0x275   : > { %4376 = vmatprep.subr.bf16.mxu0 %v1883_v47 }
 0x276   : > { %4377 = vmatpush3.bf16.msra.mxu0 %v1883_v47 }
 0x278   : > { %2103 = vperm.xlu0 %4602, %v1832_v39   ;;  %2108 = vperm.xlu1 %4601, %v1833_v48  }
 0x279   : > { %4379 = vmatmul.mubr.msk.bf16.vlgmr.msra.gmra.mxu0 %vm441_vm1, %v4644_v49  ;;  %v2115_v49 = vld [vmem:[%s5432_s6] sm:$0xff] }
 0x27a   : > { %4394 = vmatprep.mubr.msk.bf16.mxu0 %vm441_vm1, %v4646_v50  ;;  %v2164_v50 = vsel %vm441_vm1, %v2115_v49, 0 }
 0x27c   : > { %2093 = vperm.xlu0 %4602, %v1830_v22   ;;  %2098 = vperm.xlu1 %4601, %v1831_v19   ;;  %v5141_v22 = vand.u32 4294901760, %v2164_v50 }
 0x27e   : > { %v5144_v19 = vsub.f32 %v2164_v50, %v5141_v22 }
 0x2e2   : > { %v4615_v20 = vpop.permute.xlu0 %4614  ;;  %v4605_v18 = vpop.permute.xlu1 %4604 }
 0x2e3   : > { %v4617_v28 = vunpack.i.h.bf16 %v4615_v20  ;;  %v4616_v29 = vunpack.i.l.bf16 %v4615_v20  ;;  %v4607_v31 = vunpack.i.h.bf16 %v4605_v18  ;;  %v4606_v34 = vunpack.i.l.bf16 %v4605_v18 }
 0x2e4   : > { %v5148_v20 = vand.u32 4294901760, %v5144_v19 }
 0x2e5   : > { %v3939_v43 = vpack.c.bf16 %v4617_v28, %v4616_v29  ;;  %v3923_v44 = vpack.c.bf16 %v4607_v31, %v4606_v34  ;;  %v2121_v29 = vld [vmem:[%s5433_s7 + $0x10] sm:$0xff]  ;;  %v2122_v31 = vld [vmem:[%s5433_s7 + $0x18] sm:$0xff] }
 0x2e6   : > { %v4620_v51 = vpop.permute.xlu0 %4619  ;;  %v4610_v52 = vpop.permute.xlu1 %4609  ;;  %v2247_v18 = vsub.f32 %v5144_v19, %v5148_v20  ;;  %v2125_v34 = vld [vmem:[%s5434_s8 + $0x10] sm:$0xff] }
 0x2e7   : > { %v4622_v53 = vunpack.i.h.bf16 %v4620_v51  ;;  %v4621_v54 = vunpack.i.l.bf16 %v4620_v51  ;;  %v4612_v55 = vunpack.i.h.bf16 %v4610_v52  ;;  %v4611_v56 = vunpack.i.l.bf16 %v4610_v52  ;;  %4382 = vmatprep.subr.msk.bf16.mxu1 %vm5077_vm5, %v3923_v44  ;;  %4390 = vmatprep.subr.msk.bf16.mxu0 %vm5081_vm6, %v3939_v43  ;;  %v2117_v51 = vld [vmem:[%s5432_s6 + $0x10] sm:$0xff] }
 0x2e8   : > { %4383 = vmatpush3.bf16.msk.msra.mxu1 %vm5077_vm5, %v3923_v44  ;;  %4391 = vmatpush3.bf16.msk.msra.mxu0 %vm5081_vm6, %v3939_v43  ;;  %v5152_v28 = vand.u32 4294901760, %v2247_v18  ;;  %v2126_v43 = vld [vmem:[%s5434_s8 + $0x18] sm:$0xff]  ;;  %v2116_v44 = vld [vmem:[%s5432_s6 + $0x8] sm:$0xff] }
 0x2e9   : > { %v3942_v57 = vpack.c.bf16 %v4622_v53, %v4621_v54  ;;  %v3928_v58 = vpack.c.bf16 %v4612_v55, %v4611_v56  ;;  %v2167_v52 = vsel %vm441_vm1, %v2116_v44, 0  ;;  %v2170_v53 = vsel %vm441_vm1, %v2117_v51, 0  ;;  %v2118_v54 = vld [vmem:[%s5432_s6 + $0x18] sm:$0xff] }
 0x2ea   : > { %v5178_v55 = vand.u32 4294901760, %v2167_v52 }
 0x2eb   : > { %4384 = vmatprep.subr.msk.bf16.mxu1 %vm5077_vm5, %v3928_v58  ;;  %4392 = vmatprep.subr.msk.bf16.mxu0 %vm5081_vm6, %v3942_v57 }
 0x2ec   : > { %4385 = vmatpush3.bf16.msk.msra.mxu1 %vm5077_vm5, %v3928_v58  ;;  %4393 = vmatpush3.bf16.msk.msra.mxu0 %vm5081_vm6, %v3942_v57  ;;  %v5180_v57 = vand.u32 4294901760, %v2170_v53  ;;  %v2173_v58 = vsel %vm441_vm1, %v2118_v54, 0 }
 0x2ef   : > { %4387 = vmatmul.mubr.msk.bf16.vlgmr.msra.gmra.mxu1 %vm441_vm1, %v4647_v59  ;;  %4395 = vmatmul.mubr.msk.bf16.vlgmr.msra.gmra.mxu0 %vm441_vm1, %v4648_v60  ;;  %v5184_v60 = vsub.f32 %v2167_v52, %v5178_v55 }
 0x2f0   : > { %4420 = vmatprep.mubr.f32.mxu0 %v5141_v22  ;;  %4406 = vmatprep.mubr.f32.mxu1 %v5152_v28 }
 0x2f3   : > { %v2104_v9 = vpop.permute.xlu0 %2103  ;;  %v2109_v10 = vpop.permute.xlu1 %2108 }
 0x2f7   : > { %v2094_v26 = vpop.permute.xlu0 %2093  ;;  %v2099_v30 = vpop.permute.xlu1 %2098 }
 0x339   : > { %v4380_v61 = vpop.f32.mrf.mxu0 }
 0x33b   : > { %v1935_v62 = vpop.f32.mrf.mxu0 }
 0x33d   : > { %v4381_v63 = vpop.f32.mrf.mxu0 }
 0x33f   : > { %v1938_v3 = vpop.f32.mrf.mxu0 }
 0x3af   : > { %v4388_v4 = vpop.f32.mrf.mxu1  ;;  %v4396_v6 = vpop.f32.mrf.mxu0 }
 0x3b0   : > { %v2009_v7 = vadd.f32 %v4388_v4, %v4380_v61 }
 0x3b1   : > { %v2000_v8 = vpop.f32.mrf.mxu1  ;;  %v2072_v1 = vpop.f32.mrf.mxu0 }
 0x3b2   : > { %v2089_v0 = vadd.f32 %v4396_v6, %v2009_v7  ;;  %v2001_v11 = vadd.f32 %v2000_v8, %v1935_v62  ;;  %v5188_v62 = vand.u32 4294901760, %v2173_v58  ;;  %v5195_v8 = vand.u32 4294901760, %v5184_v60 }
 0x3b3   : > { %v4389_v12 = vpop.f32.mrf.mxu1  ;;  %v4397_v13 = vpop.f32.mrf.mxu0 }
 0x3b4   : > { %v5109_v2 = vadd.f32 %v2104_v9, %v2089_v0  ;;  %v2012_v14 = vadd.f32 %v4389_v12, %v4381_v63  ;;  %v2087_v16 = vadd.f32 %v2072_v1, %v2001_v11 }
 0x3b5   : > { %v2003_v15 = vpop.f32.mrf.mxu1  ;;  %v2075_v23 = vpop.f32.mrf.mxu0 }
 0x3b6   : > { %v2090_v17 = vadd.f32 %v4397_v13, %v2012_v14  ;;  %v2004_v21 = vadd.f32 %v2003_v15, %v1938_v3  ;;  %v2133_v5 = vsel %vm404_vm0, %v5109_v2, 0.0  ;;  %v5115_v32 = vadd.f32 %v2094_v26, %v2087_v16 }
 0x3b7   : > { %2134 = vadd.xlane.f32.xlu0 %v2133_v5  ;;  %v2145_v42 = vmul.f32 %v5109_v2, %v5109_v2  ;;  %v5191_v3 = vsub.f32 %v2170_v53, %v5180_v57  ;;  %v2257_v16 = vsub.f32 %v5184_v60, %v5195_v8 }
 0x3b8   : > { %v5113_v24 = vadd.f32 %v2109_v10, %v2090_v17  ;;  %v2088_v25 = vadd.f32 %v2075_v23, %v2004_v21  ;;  %v2127_v27 = vsel %vm404_vm0, %v5115_v32, 0.0  ;;  %v2143_v47 = vmul.f32 %v5115_v32, %v5115_v32 }
 0x3b9   : > { %v2153_v46 = vsel %vm404_vm0, %v2145_v42, 0.0  ;;  %v5200_v10 = vsub.f32 %v2173_v58, %v5188_v62  ;;  %v5203_v11 = vand.u32 4294901760, %v5191_v3 }
 0x3ba   : > { %v5117_v33 = vadd.f32 %v2099_v30, %v2088_v25  ;;  %v2136_v36 = vsel %vm404_vm0, %v5113_v24, 0.0  ;;  %v2146_v41 = vmul.f32 %v5113_v24, %v5113_v24  ;;  %v2147_v48 = vsel %vm404_vm0, %v2143_v47, 0.0 }
 0x3bb   : > { %2137 = vadd.xlane.f32.xlu1 %v2136_v36  ;;  %v5219_v23 = vand.u32 4294901760, %v5200_v10  ;;  %v2267_v36 = vsub.f32 %v5191_v3, %v5203_v11 }
 0x3bc   : > { %v2130_v37 = vsel %vm404_vm0, %v5117_v33, 0.0  ;;  %v2156_v45 = vsel %vm404_vm0, %v2146_v41, 0.0  ;;  %v2144_v38 = vmul.f32 %v5117_v33, %v5117_v33 }
 0x3bd   : > { %2131 = vadd.xlane.f32.xlu0 %v2130_v37  ;;  %v5228_v37 = vand.u32 4294901760, %v2257_v16  ;;  %v2277_v42 = vsub.f32 %v5200_v10, %v5219_v23  ;;  %v5234_v47 = vand.u32 4294901760, %v2267_v36 }
 0x3be   : > { %v2150_v39 = vsel %vm404_vm0, %v2144_v38, 0.0 }
 0x3bf   : > { %2128 = vadd.xlane.f32.xlu1 %v2127_v27 }
 0x3c1   : > { %2157 = vadd.xlane.f32.xlu0 %v2156_v45 }
 0x3c3   : > { %2154 = vadd.xlane.f32.xlu1 %v2153_v46 }
 0x3c5   : > { %2151 = vadd.xlane.f32.xlu0 %v2150_v39 }
 0x3c7   : > { %2148 = vadd.xlane.f32.xlu1 %v2147_v48  ;;  %v5237_v48 = vand.u32 4294901760, %v2277_v42 }
 0x3d8   : > { %3487 = vperm.xlu1 %4601, %v2121_v29  }
 0x3db   : > { %3492 = vperm.xlu0 %4602, %v2122_v31  }
 0x3dc   : > { %3511 = vperm.xlu1 %4601, %v2125_v34  }
 0x3df   : > { %3516 = vperm.xlu0 %4602, %v2126_v43  }
 0x440   : > { %v2135_v56 = vpop.xlane.xlu0 %2134 }
 0x441   : > { %v2141_v59 = vmul.f32 0.0625, %v2135_v56 }
 0x443   : > { %v5186_v61 = vand.u32 4294901760, %v2141_v59 }
 0x444   : > { %v2138_v63 = vpop.xlane.xlu1 %2137 }
 0x445   : > { %v2317_v4 = vsub.f32 %v2141_v59, %v5186_v61  ;;  %v2142_v6 = vmul.f32 0.0625, %v2138_v63 }
 0x446   : > { %v2132_v7 = vpop.xlane.xlu0 %2131 }
 0x447   : > { %v5197_v1 = vand.u32 4294901760, %v2142_v6  ;;  %v2140_v9 = vmul.f32 0.0625, %v2132_v7  ;;  %v5209_v15 = vand.u32 4294901760, %v2317_v4 }
 0x448   : > { %v2129_v0 = vpop.xlane.xlu1 %2128 }
 0x449   : > { %v2310_v12 = vsub.f32 %v2142_v6, %v5197_v1  ;;  %v5206_v13 = vand.u32 4294901760, %v2140_v9  ;;  %v2139_v14 = vmul.f32 0.0625, %v2129_v0  ;;  %4398 = vmatprep.subr.mxu1 %v5197_v1  ;;  %v2319_v30 = vsub.f32 %v2317_v4, %v5209_v15 }
 0x44a   : > { %4399 = vmatpush3.msra.mxu1 %v5197_v1  ;;  %v2158_v18 = vpop.xlane.xlu0 %2157 }
 0x44b   : > { %v2324_v17 = vsub.f32 %v2140_v9, %v5206_v13  ;;  %v5215_v21 = vand.u32 4294901760, %v2139_v14  ;;  %4400 = vmatprep.subr.mxu1 %v5186_v61  ;;  %v2311_v5 = vand.u32 4294901760, %v2310_v12  ;;  %v2320_v46 = vand.u32 4294901760, %v2319_v30 }
 0x44c   : > { %4401 = vmatpush3.msra.mxu1 %v5186_v61  ;;  %v2162_v29 = vmul.f32 0.0625, %v2158_v18  ;;  %v2155_v31 = vpop.xlane.xlu1 %2154 }
 0x44d   : > { %v2331_v25 = vsub.f32 %v2139_v14, %v5215_v21  ;;  %4402 = vmatprep.subr.mxu1 %v5206_v13  ;;  %v2312_v26 = vsub.f32 %v2310_v12, %v2311_v5  ;;  %v2325_v41 = vand.u32 4294901760, %v2324_v17  ;;  %v2161_v34 = vmul.f32 0.0625, %v2155_v31 }
 0x44e   : > { %4403 = vmatpush3.msra.mxu1 %v5206_v13  ;;  %v2152_v43 = vpop.xlane.xlu0 %2151  ;;  %v5252_v44 = vand.u32 4294901760, %v2162_v29 }
 0x44f   : > { %4404 = vmatprep.subr.mxu1 %v5215_v21  ;;  %v2313_v27 = vand.u32 4294901760, %v2312_v26  ;;  %v2326_v45 = vsub.f32 %v2324_v17, %v2325_v41  ;;  %v2332_v38 = vand.u32 4294901760, %v2331_v25  ;;  %v2160_v51 = vmul.f32 0.0625, %v2152_v43 }
 0x450   : > { %4405 = vmatpush3.msra.mxu1 %v5215_v21  ;;  %v2149_v52 = vpop.xlane.xlu1 %2148  ;;  %v5258_v53 = vand.u32 4294901760, %v2161_v34  ;;  %v2928_v54 = vsub.f32 %v2162_v29, %v5252_v44 }
 0x451   : > { %4412 = vmatprep.subr.mxu0 %v2313_v27  ;;  %4426 = vmatprep.subr.mxu1 %v2310_v12  ;;  %v2333_v39 = vsub.f32 %v2331_v25, %v2332_v38  ;;  %v2327_v49 = vand.u32 4294901760, %v2326_v45  ;;  %v2159_v56 = vmul.f32 0.0625, %v2149_v52  ;;  %v5265_v58 = vand.u32 4294901760, %v2160_v51 }
 0x452   : > { %4407 = vmatmul.mubr.f32.vlgmr.msra.gmra.mxu1 %v5228_v37  ;;  %4413 = vmatpush3.msra.mxu0 %v2313_v27  ;;  %v2935_v59 = vsub.f32 %v2161_v34, %v5258_v53  ;;  %v2929_v63 = vand.u32 4294901760, %v2928_v54 }
 0x453   : > { %4427 = vmatpush3.msra.mxu1 %v2310_v12  ;;  %4414 = vmatprep.subr.mxu0 %v2320_v46  ;;  %v2334_v50 = vand.u32 4294901760, %v2333_v39  ;;  %v2942_v6 = vsub.f32 %v2160_v51, %v5265_v58 }
 0x454   : > { %4428 = vmatprep.subr.mxu1 %v2317_v4  ;;  %4415 = vmatpush3.msra.mxu0 %v2320_v46  ;;  %v2936_v7 = vand.u32 4294901760, %v2935_v59 }
 0x455   : > { %4429 = vmatpush3.msra.mxu1 %v2317_v4  ;;  %4409 = vmatprep.mubr.f32.mxu1 %v5234_v47  ;;  %v5274_v4 = vand.u32 4294901760, %v2159_v56 }
 0x456   : > { %4416 = vmatprep.subr.mxu0 %v2327_v49  ;;  %4430 = vmatprep.subr.mxu1 %v2324_v17  ;;  %v2937_v0 = vsub.f32 %v2935_v59, %v2936_v7 }
 0x457   : > { %4417 = vmatpush3.msra.mxu0 %v2327_v49  ;;  %4410 = vmatmul.mubr.f32.gmra.mxu1 %v5237_v48  ;;  %v2949_v9 = vsub.f32 %v2159_v56, %v5274_v4 }
 0x458   : > { %4431 = vmatpush3.msra.mxu1 %v2324_v17  ;;  %4418 = vmatprep.subr.mxu0 %v2334_v50 }
 0x459   : > { %4432 = vmatprep.subr.mxu1 %v2331_v25  ;;  %4419 = vmatpush3.msra.mxu0 %v2334_v50  ;;  %v2950_v14 = vand.u32 4294901760, %v2949_v9 }
 0x45a   : > { %4433 = vmatpush3.msra.mxu1 %v2331_v25  ;;  %4421 = vmatmul.mubr.f32.vlgmr.msra.gmra.mxu0 %v5178_v55 }
 0x45b   : > { %4434 = vmatprep.mubr.f32.mxu1 %v5144_v19  ;;  %4440 = vmatprep.subr.mxu0 %v5197_v1  ;;  %v2951_v16 = vsub.f32 %v2949_v9, %v2950_v14 }
 0x45c   : > { %4454 = vmatprep.subr.mxu1 %v2311_v5  ;;  %4435 = vmatmul.mubr.f32.vlgmr.msra.gmra.mxu1 %v5184_v60 }
 0x45d   : > { %4441 = vmatpush3.msra.mxu0 %v5197_v1  ;;  %4455 = vmatpush3.msra.mxu1 %v2311_v5 }
 0x45e   : > { %4442 = vmatprep.subr.mxu0 %v5186_v61  ;;  %4456 = vmatprep.subr.mxu1 %v5209_v15 }
 0x45f   : > { %4423 = vmatprep.mubr.f32.mxu0 %v5180_v57  ;;  %4443 = vmatpush3.msra.mxu0 %v5186_v61 }
 0x460   : > { %4457 = vmatpush3.msra.mxu1 %v5209_v15  ;;  %4424 = vmatmul.mubr.f32.gmra.mxu0 %v5188_v62  ;;  %v2938_v15 = vand.u32 4294901760, %v2937_v0 }
 0x461   : > { %4437 = vmatprep.mubr.f32.mxu1 %v5191_v3  ;;  %4444 = vmatprep.subr.mxu0 %v5206_v13 }
 0x462   : > { %4458 = vmatprep.subr.mxu1 %v2325_v41  ;;  %4438 = vmatmul.mubr.f32.gmra.mxu1 %v5200_v10 }
 0x463   : > { %4445 = vmatpush3.msra.mxu0 %v5206_v13  ;;  %4459 = vmatpush3.msra.mxu1 %v2325_v41 }
 0x464   : > { %4446 = vmatprep.subr.mxu0 %v5215_v21  ;;  %4460 = vmatprep.subr.mxu1 %v2332_v38 }
 0x465   : > { %4447 = vmatpush3.msra.mxu0 %v5215_v21  ;;  %4448 = vmatprep.mubr.f32.mxu0 %v5148_v20 }
 0x466   : > { %4461 = vmatpush3.msra.mxu1 %v2332_v38  ;;  %4449 = vmatmul.mubr.f32.vlgmr.msra.gmra.mxu0 %v5195_v8 }
 0x467   : > { %4462 = vmatprep.mubr.f32.mxu1 %v5141_v22  ;;  %4468 = vmatprep.subr.mxu0 %v5197_v1 }
 0x468   : > { %4482 = vmatprep.subr.mxu1 %v5252_v44  ;;  %4463 = vmatmul.mubr.f32.vlgmr.msra.gmra.mxu1 %v5178_v55 }
 0x469   : > { %4469 = vmatpush3.msra.mxu0 %v5197_v1  ;;  %4483 = vmatpush3.msra.mxu1 %v5252_v44  ;;  %v2930_v1 = vsub.f32 %v2928_v54, %v2929_v63 }
 0x46a   : > { %4470 = vmatprep.subr.mxu0 %v5186_v61  ;;  %4484 = vmatprep.subr.mxu1 %v5258_v53 }
 0x46b   : > { %4451 = vmatprep.mubr.f32.mxu0 %v5203_v11  ;;  %4471 = vmatpush3.msra.mxu0 %v5186_v61  ;;  %v2943_v61 = vand.u32 4294901760, %v2942_v6  ;;  %v2931_v12 = vand.u32 4294901760, %v2930_v1 }
 0x46c   : > { %4485 = vmatpush3.msra.mxu1 %v5258_v53  ;;  %4452 = vmatmul.mubr.f32.gmra.mxu0 %v5219_v23 }
 0x46d   : > { %4465 = vmatprep.mubr.f32.mxu1 %v5180_v57  ;;  %4472 = vmatprep.subr.mxu0 %v5206_v13 }
 0x46e   : > { %4486 = vmatprep.subr.mxu1 %v5265_v58  ;;  %4466 = vmatmul.mubr.f32.gmra.mxu1 %v5188_v62 }
 0x46f   : > { %4473 = vmatpush3.msra.mxu0 %v5206_v13  ;;  %4487 = vmatpush3.msra.mxu1 %v5265_v58  ;;  %v2944_v13 = vsub.f32 %v2942_v6, %v2943_v61 }
 0x470   : > { %4474 = vmatprep.subr.mxu0 %v5215_v21  ;;  %4488 = vmatprep.subr.mxu1 %v5274_v4 }
 0x471   : > { %4475 = vmatpush3.msra.mxu0 %v5215_v21  ;;  %4476 = vmatprep.mubr.f32.mxu0 %v5141_v22  ;;  %v2945_v17 = vand.u32 4294901760, %v2944_v13 }
 0x472   : > { %4489 = vmatpush3.msra.mxu1 %v5274_v4  ;;  %4477 = vmatmul.mubr.f32.vlgmr.msra.gmra.mxu0 %v5178_v55 }
 0x473   : > { %4490 = vmatprep.mubr.f32.mxu1 %v5152_v28  ;;  %4496 = vmatprep.subr.mxu0 %v2931_v12  ;;  %v2952_v28 = vand.u32 4294901760, %v2951_v16 }
 0x474   : > { %4510 = vmatprep.subr.mxu1 %v2928_v54  ;;  %4491 = vmatmul.mubr.f32.vlgmr.msra.gmra.mxu1 %v5228_v37 }
 0x475   : > { %4497 = vmatpush3.msra.mxu0 %v2931_v12  ;;  %4511 = vmatpush3.msra.mxu1 %v2928_v54 }
 0x476   : > { %4498 = vmatprep.subr.mxu0 %v2938_v15  ;;  %4512 = vmatprep.subr.mxu1 %v2935_v59 }
 0x477   : > { %4479 = vmatprep.mubr.f32.mxu0 %v5180_v57  ;;  %4499 = vmatpush3.msra.mxu0 %v2938_v15 }
 0x478   : > { %4513 = vmatpush3.msra.mxu1 %v2935_v59  ;;  %4480 = vmatmul.mubr.f32.gmra.mxu0 %v5188_v62 }
 0x479   : > { %4493 = vmatprep.mubr.f32.mxu1 %v5234_v47  ;;  %4500 = vmatprep.subr.mxu0 %v2945_v17 }
 0x47a   : > { %4514 = vmatprep.subr.mxu1 %v2942_v6  ;;  %4494 = vmatmul.mubr.f32.gmra.mxu1 %v5237_v48 }
 0x47b   : > { %4501 = vmatpush3.msra.mxu0 %v2945_v17  ;;  %4515 = vmatpush3.msra.mxu1 %v2942_v6 }
 0x47c   : > { %4502 = vmatprep.subr.mxu0 %v2952_v28  ;;  %4516 = vmatprep.subr.mxu1 %v2949_v9 }
 0x47d   : > { %4503 = vmatpush3.msra.mxu0 %v2952_v28  ;;  %4504 = vmatprep.mubr.f32.mxu0 %v5141_v22 }
 0x47e   : > { %4517 = vmatpush3.msra.mxu1 %v2949_v9  ;;  %4505 = vmatmul.mubr.f32.vlgmr.msra.gmra.mxu0 %v5178_v55 }
 0x47f   : > { %4518 = vmatprep.mubr.f32.mxu1 %v5144_v19  ;;  %4524 = vmatprep.subr.mxu0 %v5252_v44 }
 0x480   : > { %4538 = vmatprep.subr.mxu1 %v2929_v63  ;;  %4519 = vmatmul.mubr.f32.vlgmr.msra.gmra.mxu1 %v5184_v60 }
 0x481   : > { %4525 = vmatpush3.msra.mxu0 %v5252_v44  ;;  %4539 = vmatpush3.msra.mxu1 %v2929_v63 }
 0x482   : > { %4526 = vmatprep.subr.mxu0 %v5258_v53  ;;  %4540 = vmatprep.subr.mxu1 %v2936_v7 }
 0x483   : > { %4507 = vmatprep.mubr.f32.mxu0 %v5180_v57  ;;  %4527 = vmatpush3.msra.mxu0 %v5258_v53 }
 0x484   : > { %4541 = vmatpush3.msra.mxu1 %v2936_v7  ;;  %4508 = vmatmul.mubr.f32.gmra.mxu0 %v5188_v62 }
 0x485   : > { %4528 = vmatprep.subr.mxu0 %v5265_v58  ;;  %4542 = vmatprep.subr.mxu1 %v2943_v61 }
 0x486   : > { %4521 = vmatprep.mubr.f32.mxu1 %v5191_v3  ;;  %4529 = vmatpush3.msra.mxu0 %v5265_v58 }
 0x487   : > { %4543 = vmatpush3.msra.mxu1 %v2943_v61  ;;  %4530 = vmatprep.subr.mxu0 %v5274_v4 }
 0x488   : > { %4522 = vmatmul.mubr.f32.gmra.mxu1 %v5200_v10  ;;  %4544 = vmatprep.subr.mxu1 %v2950_v14 }
 0x489   : > { %4531 = vmatpush3.msra.mxu0 %v5274_v4  ;;  %4532 = vmatprep.mubr.f32.mxu0 %v5148_v20 }
 0x48a   : > { %4545 = vmatpush3.msra.mxu1 %v2950_v14  ;;  %4533 = vmatmul.mubr.f32.vlgmr.msra.gmra.mxu0 %v5195_v8 }
 0x48b   : > { %4552 = vmatprep.subr.mxu0 %v5252_v44  ;;  %4546 = vmatprep.mubr.f32.mxu1 %v5141_v22 }
 0x48c   : > { %4553 = vmatpush3.msra.mxu0 %v5252_v44  ;;  %4547 = vmatmul.mubr.f32.vlgmr.msra.gmra.mxu1 %v5178_v55 }
 0x48d   : > { %4554 = vmatprep.subr.mxu0 %v5258_v53  ;;  %4535 = vmatprep.mubr.f32.mxu0 %v5203_v11 }
 0x48e   : > { %4555 = vmatpush3.msra.mxu0 %v5258_v53  ;;  %4549 = vmatprep.mubr.f32.mxu1 %v5180_v57 }
 0x48f   : > { %4536 = vmatmul.mubr.f32.gmra.mxu0 %v5219_v23  ;;  %4556 = vmatprep.subr.mxu0 %v5265_v58 }
 0x490   : > { %4557 = vmatpush3.msra.mxu0 %v5265_v58  ;;  %4550 = vmatmul.mubr.f32.gmra.mxu1 %v5188_v62 }
 0x491   : > { %4558 = vmatprep.subr.mxu0 %v5274_v4  ;;  %4560 = vmatprep.mubr.f32.mxu0 %v5141_v22 }
 0x492   : > { %4559 = vmatpush3.msra.mxu0 %v5274_v4 }
 0x493   : > { %4561 = vmatmul.mubr.f32.vlgmr.msra.gmra.mxu0 %v5178_v55 }
 0x494   : > { %4563 = vmatprep.mubr.f32.mxu0 %v5180_v57 }
 0x497   : > { %4564 = vmatmul.mubr.f32.gmra.mxu0 %v5188_v62 }
 0x512   : > { %v4408_v19 = vpop.f32.mrf.mxu1 }
 0x514   : > { %v2250_v20 = vpop.f32.mrf.mxu1 }
 0x517   : > { %v4411_v60 = vpop.f32.mrf.mxu1 }
 0x519   : > { %v2270_v3 = vpop.f32.mrf.mxu1 }
 0x51a   : > { %v4422_v8 = vpop.f32.mrf.mxu0 }
 0x51b   : > { %v2378_v30 = vadd.f32 %v4422_v8, %v4408_v19 }
 0x51c   : > { %v2371_v10 = vpop.f32.mrf.mxu0  ;;  %v4436_v11 = vpop.f32.mrf.mxu1 }
 0x51d   : > { %v2372_v37 = vadd.f32 %v2371_v10, %v2250_v20  ;;  %v2477_v41 = vadd.f32 %v4436_v11, %v2378_v30 }
 0x51e   : > { %v2469_v21 = vpop.f32.mrf.mxu1 }
 0x51f   : > { %v2470_v42 = vadd.f32 %v2469_v21, %v2372_v37 }
 0x520   : > { %v4425_v5 = vpop.f32.mrf.mxu0 }
 0x521   : > { %v2390_v27 = vadd.f32 %v4425_v5, %v4411_v60 }
 0x522   : > { %v2383_v23 = vpop.f32.mrf.mxu0  ;;  %v4439_v25 = vpop.f32.mrf.mxu1 }
 0x523   : > { %v2384_v47 = vadd.f32 %v2383_v23, %v2270_v3  ;;  %v2491_v49 = vadd.f32 %v4439_v25, %v2390_v27 }
 0x524   : > { %v2483_v22 = vpop.f32.mrf.mxu1 }
 0x525   : > { %v2484_v29 = vadd.f32 %v2483_v22, %v2384_v47 }
 0x526   : > { %v4450_v26 = vpop.f32.mrf.mxu0 }
 0x527   : > { %v2576_v45 = vadd.f32 %v4450_v26, %v2477_v41 }
 0x528   : > { %v2567_v36 = vpop.f32.mrf.mxu0  ;;  %v4464_v55 = vpop.f32.mrf.mxu1 }
 0x529   : > { %v2568_v39 = vadd.f32 %v2567_v36, %v2470_v42  ;;  %v2681_v50 = vadd.f32 %v4464_v55, %v2576_v45 }
 0x52a   : > { %v2674_v57 = vpop.f32.mrf.mxu1 }
 0x52b   : > { %v2675_v34 = vadd.f32 %v2674_v57, %v2568_v39 }
 0x52c   : > { %v4453_v62 = vpop.f32.mrf.mxu0 }
 0x52d   : > { %v2592_v31 = vadd.f32 %v4453_v62, %v2491_v49 }
 0x52e   : > { %v2583_v38 = vpop.f32.mrf.mxu0  ;;  %v4467_v46 = vpop.f32.mrf.mxu1 }
 0x52f   : > { %v2584_v52 = vadd.f32 %v2583_v38, %v2484_v29  ;;  %v2693_v58 = vadd.f32 %v4467_v46, %v2592_v31 }
 0x530   : > { %v2686_v48 = vpop.f32.mrf.mxu1 }
 0x531   : > { %v2687_v4 = vadd.f32 %v2686_v48, %v2584_v52 }
 0x532   : > { %v4478_v18 = vpop.f32.mrf.mxu0 }
 0x533   : > { %v2774_v43 = vadd.f32 %v4478_v18, %v2681_v50 }
 0x534   : > { %v2767_v44 = vpop.f32.mrf.mxu0  ;;  %v4492_v51 = vpop.f32.mrf.mxu1 }
 0x535   : > { %v2790_v53 = vmul.f32 0.25, %v2774_v43  ;;  %v2768_v54 = vadd.f32 %v2767_v44, %v2675_v34 }
 0x536   : > { %v2868_v56 = vpop.f32.mrf.mxu1 }
 0x537   : > { %v2789_v59 = vmul.f32 0.25, %v2768_v54  ;;  %3426 = vperm.xlu0 %4602, %v2790_v53   ;;  %v3412_v48 = vmul.f32 %v2790_v53, %v2790_v53 }
 0x538   : > { %v4481_v63 = vpop.f32.mrf.mxu0 }
 0x539   : > { %v2786_v6 = vadd.f32 %v4481_v63, %v2693_v58  ;;  %3421 = vperm.xlu1 %4601, %v2789_v59   ;;  %v3411_v29 = vmul.f32 %v2789_v59, %v2789_v59 }
 0x53a   : > { %v2779_v7 = vpop.f32.mrf.mxu0  ;;  %v4495_v1 = vpop.f32.mrf.mxu1 }
 0x53b   : > { %v2792_v9 = vmul.f32 0.25, %v2786_v6  ;;  %v2780_v61 = vadd.f32 %v2779_v7, %v2687_v4 }
 0x53c   : > { %v2888_v0 = vpop.f32.mrf.mxu1 }
 0x53d   : > { %v2791_v12 = vmul.f32 0.25, %v2780_v61  ;;  %3436 = vperm.xlu1 %4601, %v2792_v9   ;;  %v3414_v52 = vmul.f32 %v2792_v9, %v2792_v9 }
 0x53e   : > { %v4506_v14 = vpop.f32.mrf.mxu0 }
 0x53f   : > { %3431 = vperm.xlu0 %4602, %v2791_v12   ;;  %v2996_v19 = vadd.f32 %v4506_v14, %v4492_v51  ;;  %v3413_v6 = vmul.f32 %v2791_v12, %v2791_v12  ;;  %v2120_v12 = vld [vmem:[%s5433_s7 + $0x8] sm:$0xff] }
 0x540   : > { %v2989_v13 = vpop.f32.mrf.mxu0  ;;  %v4520_v15 = vpop.f32.mrf.mxu1 }
 0x541   : > { %v2990_v60 = vadd.f32 %v2989_v13, %v2868_v56  ;;  %v3095_v10 = vadd.f32 %v4520_v15, %v2996_v19  ;;  %v3488_v19 = vpop.permute.xlu1 %3487 }
 0x542   : > { %v3087_v17 = vpop.f32.mrf.mxu1 }
 0x543   : > { %v3088_v23 = vadd.f32 %v3087_v17, %v2990_v60  ;;  %v2124_v17 = vld [vmem:[%s5434_s8 + $0x8] sm:$0xff] }
 0x544   : > { %v4509_v16 = vpop.f32.mrf.mxu0 }
 0x545   : > { %v3008_v11 = vadd.f32 %v4509_v16, %v4495_v1  ;;  %v2119_v16 = vld [vmem:[%s5433_s7] sm:$0xff]  ;;  %v3512_v60 = vpop.permute.xlu1 %3511 }
 0x546   : > { %v3001_v28 = vpop.f32.mrf.mxu0 }
 0x547   : > { %v3002_v25 = vadd.f32 %v3001_v28, %v2888_v0  ;;  %v2123_v28 = vld [vmem:[%s5434_s8] sm:$0xff] }
 0x548   : > { %v4523_v20 = vpop.f32.mrf.mxu1 }
 0x549   : > { %v3109_v36 = vadd.f32 %v4523_v20, %v3008_v11  ;;  %v3493_v20 = vpop.permute.xlu0 %3492 }
 0x54a   : > { %v3101_v3 = vpop.f32.mrf.mxu1  ;;  %v4534_v8 = vpop.f32.mrf.mxu0 }
 0x54b   : > { %v3194_v22 = vadd.f32 %v4534_v8, %v3095_v10  ;;  %v3102_v41 = vadd.f32 %v3101_v3, %v3002_v25 }
 0x54c   : > { %v3185_v21 = vpop.f32.mrf.mxu0  ;;  %v4548_v5 = vpop.f32.mrf.mxu1 }
 0x54d   : > { %v3186_v55 = vadd.f32 %v3185_v21, %v3088_v23  ;;  %v3299_v62 = vadd.f32 %v4548_v5, %v3194_v22  ;;  %v3517_v3 = vpop.permute.xlu0 %3516 }
 0x54e   : > { %v3292_v26 = vpop.f32.mrf.mxu1 }
 0x54f   : > { %v4537_v30 = vpop.f32.mrf.mxu0  ;;  %v3293_v45 = vadd.f32 %v3292_v26, %v3186_v55 }
 0x550   : > { %v4551_v57 = vpop.f32.mrf.mxu1  ;;  %v3210_v27 = vadd.f32 %v4537_v30, %v3109_v36 }
 0x551   : > { %v3201_v37 = vpop.f32.mrf.mxu0 }
 0x552   : > { %v3202_v38 = vadd.f32 %v3201_v37, %v3102_v41  ;;  %v3304_v47 = vpop.f32.mrf.mxu1  ;;  %v3311_v49 = vadd.f32 %v4551_v57, %v3210_v27 }
 0x553   : > { %v4562_v42 = vpop.f32.mrf.mxu0 }
 0x554   : > { %v3392_v46 = vadd.f32 %v4562_v42, %v3299_v62  ;;  %v3305_v34 = vadd.f32 %v3304_v47, %v3202_v38 }
 0x555   : > { %v3385_v39 = vpop.f32.mrf.mxu0 }
 0x556   : > { %v3408_v50 = vmul.f32 0.25, %v3392_v46  ;;  %v3386_v18 = vadd.f32 %v3385_v39, %v3293_v45 }
 0x557   : > { %v4565_v31 = vpop.f32.mrf.mxu0 }
 0x558   : > { %v3416_v43 = vsub.f32 %v3408_v50, %v3412_v48  ;;  %v3407_v44 = vmul.f32 0.25, %v3386_v18  ;;  %v3404_v51 = vadd.f32 %v4565_v31, %v3311_v49 }
 0x559   : > { %v3397_v54 = vpop.f32.mrf.mxu0 }
 0x55a   : > { %v3444_v56 = vadd.f32 1e-06, %v3416_v43  ;;  %v3415_v58 = vsub.f32 %v3407_v44, %v3411_v29  ;;  %v3410_v63 = vmul.f32 0.25, %v3404_v51  ;;  %v3398_v4 = vadd.f32 %v3397_v54, %v3305_v34 }
 0x55c   : > { %4679 = vrsqrt.f32 %v3444_v56  ;;  %v3443_v7 = vadd.f32 1e-06, %v3415_v58  ;;  %v3418_v1 = vsub.f32 %v3410_v63, %v3414_v52  ;;  %v3409_v53 = vmul.f32 0.25, %v3398_v4  ;;  %v4649_v58 = vld [vmem:[%s5435_s9 + $0x10] sm:$0xff]  }
 0x55d   : > { %4570 = vmatprep.mubr.msk.bf16.mxu1 %vm441_vm1, %v4649_v58 }
 0x55e   : > { %4681 = vrsqrt.f32 %v3443_v7  ;;  %v3446_v61 = vadd.f32 1e-06, %v3418_v1  ;;  %v3417_v0 = vsub.f32 %v3409_v53, %v3413_v6  ;;  %v4651_v1 = vld [vmem:[%s5435_s9] sm:$0xff]  }
 0x55f   : > { %4578 = vmatprep.mubr.msk.bf16.mxu0 %vm441_vm1, %v4651_v1  ;;  %v4705_v1 = vld [vmem:[%s4794_s22 + $0x18] sm:$0xff] }
 0x560   : > { %4683 = vrsqrt.f32 %v3446_v61  ;;  %v3445_v59 = vadd.f32 1e-06, %v3417_v0 }
 0x562   : > { %4685 = vrsqrt.f32 %v3445_v59 }
 0x569   : > { %v4680_v14 = vpop.eup %4679 }
 0x56a   : > { %3458 = vperm.xlu0 %4602, %v4680_v14  }
 0x56b   : > { %v4682_v13 = vpop.eup %4681 }
 0x56c   : > { %3453 = vperm.xlu1 %4601, %v4682_v13  }
 0x56d   : > { %v4684_v9 = vpop.eup %4683 }
 0x56e   : > { %3468 = vperm.xlu0 %4602, %v4684_v9  }
 0x56f   : > { %v4686_v15 = vpop.eup %4685 }
 0x570   : > { %3463 = vperm.xlu1 %4601, %v4686_v15  }
 0x572   : > { %3482 = vperm.xlu0 %4602, %v2120_v12   ;;  %v3552_v12 = vld [vmem:[%s5436_s10 + $0x8] sm:$0xff] }
 0x574   : > { %3477 = vperm.xlu1 %4601, %v2119_v16   ;;  %v3551_v16 = vld [vmem:[%s5436_s10] sm:$0xff] }
 0x576   : > { %3506 = vperm.xlu0 %4602, %v2124_v17   ;;  %v4650_v17 = vld [vmem:[%s5435_s9 + $0x18] sm:$0xff]  }
 0x578   : > { %3501 = vperm.xlu1 %4601, %v2123_v28   ;;  %v4652_v28 = vld [vmem:[%s5435_s9 + $0x20] sm:$0xff]  }
 0x5b2   : > { %v3427_v8 = vpop.permute.xlu0 %3426 }
 0x5b3   : > { %v3440_v55 = vsub.f32 %v5117_v33, %v3427_v8 }
 0x5b4   : > { %v3422_v10 = vpop.permute.xlu1 %3421 }
 0x5b5   : > { %v3439_v62 = vsub.f32 %v5115_v32, %v3422_v10 }
 0x5b8   : > { %v3437_v21 = vpop.permute.xlu1 %3436 }
 0x5b9   : > { %v3442_v25 = vsub.f32 %v5113_v24, %v3437_v21 }
 0x5ba   : > { %v3432_v11 = vpop.permute.xlu0 %3431 }
 0x5bb   : > { %v3441_v26 = vsub.f32 %v5109_v2, %v3432_v11 }
 0x5e5   : > { %v3459_v5 = vpop.permute.xlu0 %3458 }
 0x5e6   : > { %v3472_v27 = vmul.f32 %v3459_v5, %v3440_v55 }
 0x5e7   : > { %v3454_v23 = vpop.permute.xlu1 %3453 }
 0x5e8   : > { %v3471_v46 = vmul.f32 %v3454_v23, %v3439_v62  ;;  %v4654_v62 = vld [vmem:[%s5435_s9 + $0x28] sm:$0xff]  }
 0x5e9   : > { %v3469_v22 = vpop.permute.xlu0 %3468 }
 0x5ea   : > { %v3474_v30 = vmul.f32 %v3469_v22, %v3442_v25 }
 0x5eb   : > { %v3464_v36 = vpop.permute.xlu1 %3463 }
 0x5ec   : > { %v3498_v37 = vmul.f32 %v3493_v20, %v3474_v30  ;;  %v3473_v57 = vmul.f32 %v3464_v36, %v3441_v26  ;;  %v3553_v20 = vld [vmem:[%s5436_s10 + $0x10] sm:$0xff] }
 0x5ed   : > { %v3483_v41 = vpop.permute.xlu0 %3482 }
 0x5ee   : > { %v3522_v42 = vadd.f32 %v3517_v3, %v3498_v37  ;;  %v3497_v45 = vmul.f32 %v3488_v19, %v3473_v57  ;;  %v3496_v24 = vmul.f32 %v3483_v41, %v3472_v27  ;;  %v3554_v19 = vld [vmem:[%s5436_s10 + $0x18] sm:$0xff]  ;;  %v4653_v41 = vld [vmem:[%s5435_s9 + $0x8] sm:$0xff]  }
 0x5ef   : > { %v3478_v38 = vpop.permute.xlu1 %3477 }
 0x5f0   : > { %v3949_v47 = vmul.f32 -1.442695, %v3522_v42  ;;  %v3521_v39 = vadd.f32 %v3512_v60, %v3497_v45  ;;  %v3495_v49 = vmul.f32 %v3478_v38, %v3471_v46 }
 0x5f1   : > { %v3507_v48 = vpop.permute.xlu0 %3506 }
 0x5f2   : > { %4687 = vpow2.f32 %v3949_v47  ;;  %v3948_v2 = vmul.f32 -1.442695, %v3521_v39  ;;  %v3520_v50 = vadd.f32 %v3507_v48, %v3496_v24 }
 0x5f3   : > { %v3502_v18 = vpop.permute.xlu1 %3501 }
 0x5f4   : > { %4689 = vpow2.f32 %v3948_v2  ;;  %v3947_v33 = vmul.f32 -1.442695, %v3520_v50  ;;  %v3519_v29 = vadd.f32 %v3502_v18, %v3495_v49 }
 0x5f6   : > { %4691 = vpow2.f32 %v3947_v33  ;;  %v3946_v31 = vmul.f32 -1.442695, %v3519_v29 }
 0x5f8   : > { %4693 = vpow2.f32 %v3946_v31 }
 0x5ff   : > { %v4688_v32 = vpop.eup %4687 }
 0x600   : > { %v3538_v34 = vadd.f32 1.0, %v4688_v32 }
 0x601   : > { %v4690_v43 = vpop.eup %4689 }
 0x602   : > { %4695 = vrcp.f32 %v3538_v34  ;;  %v3537_v44 = vadd.f32 1.0, %v4690_v43  ;;  %v4703_v43 = vld [vmem:[%s4794_s22 + $0x10] sm:$0xff] }
 0x603   : > { %v4692_v51 = vpop.eup %4691 }
 0x604   : > { %4697 = vrcp.f32 %v3537_v44  ;;  %v3536_v52 = vadd.f32 1.0, %v4692_v51 }
 0x605   : > { %v4694_v54 = vpop.eup %4693 }
 0x606   : > { %4699 = vrcp.f32 %v3536_v52  ;;  %v3535_v56 = vadd.f32 1.0, %v4694_v54 }
 0x608   : > { %4701 = vrcp.f32 %v3535_v56 }
 0x60f   : > { %v4696_v63 = vpop.eup %4695 }
 0x610   : > { %v3550_v6 = vmul.f32 %v4696_v63, %v3522_v42  ;;  %v4704_v63 = vld [vmem:[%s4794_s22] sm:$0xff] }
 0x611   : > { %v4698_v4 = vpop.eup %4697 }
 0x612   : > { %v3549_v7 = vmul.f32 %v4698_v4, %v3521_v39 }
 0x613   : > { %v4700_v53 = vpop.eup %4699 }
 0x614   : > { %v4633_v61 = vpack.i.bf16 %v3550_v6, %v3549_v7  ;;  %v3603_v0 = vpack.c.bf16 %v3550_v6, %v3549_v7  ;;  %v3548_v14 = vmul.f32 %v4700_v53, %v3520_v50 }
 0x615   : > { %v4702_v59 = vpop.eup %4701 }
 0x616   : > { %v3547_v13 = vmul.f32 %v4702_v59, %v3519_v29  ;;  %4634 = vrot.lane.b32.xlu0 %v4633_v61, %s4716_s20  ;;  %4624 = vrot.lane.b32.xlu1 %v4633_v61, %s4717_s21 }
 0x617   : > { %4566 = vmatprep.subr.bf16.mxu1 %v3603_v0 }
 0x618   : > { %4567 = vmatpush3.bf16.msra.mxu1 %v3603_v0  ;;  %v4638_v9 = vpack.i.bf16 %v3548_v14, %v3547_v13  ;;  %v3602_v15 = vpack.c.bf16 %v3548_v14, %v3547_v13  ;;  %v4706_v0 = vld [vmem:[%s4794_s22 + $0x8] sm:$0xff] }
 0x61a   : > { %4639 = vrot.lane.b32.xlu0 %v4638_v9, %s4716_s20  ;;  %4629 = vrot.lane.b32.xlu1 %v4638_v9, %s4717_s21 }
 0x61b   : > { %4568 = vmatprep.subr.bf16.mxu1 %v3602_v15 }
 0x61c   : > { %4569 = vmatpush3.bf16.msra.mxu1 %v3602_v15 }
 0x61e   : > { %3817 = vperm.xlu0 %4602, %v3552_v12   ;;  %3812 = vperm.xlu1 %4601, %v3551_v16  }
 0x61f   : > { %4571 = vmatmul.mubr.msk.bf16.vlgmr.msra.gmra.mxu1 %vm441_vm1, %v4650_v17 }
 0x620   : > { %4586 = vmatprep.mubr.msk.bf16.mxu1 %vm441_vm1, %v4652_v28 }
 0x622   : > { %3827 = vperm.xlu0 %4602, %v3554_v19   ;;  %3822 = vperm.xlu1 %4601, %v3553_v20  }
 0x688   : > { %v4635_v60 = vpop.permute.xlu0 %4634  ;;  %v4625_v3 = vpop.permute.xlu1 %4624 }
 0x689   : > { %v4637_v8 = vunpack.i.h.bf16 %v4635_v60  ;;  %v4636_v10 = vunpack.i.l.bf16 %v4635_v60  ;;  %v4627_v11 = vunpack.i.h.bf16 %v4625_v3  ;;  %v4626_v21 = vunpack.i.l.bf16 %v4625_v3 }
 0x68b   : > { %v3979_v5 = vpack.c.bf16 %v4637_v8, %v4636_v10  ;;  %v3963_v23 = vpack.c.bf16 %v4627_v11, %v4626_v21 }
 0x68c   : > { %v4640_v25 = vpop.permute.xlu0 %4639  ;;  %v4630_v22 = vpop.permute.xlu1 %4629 }
 0x68d   : > { %v4642_v26 = vunpack.i.h.bf16 %v4640_v25  ;;  %v4641_v30 = vunpack.i.l.bf16 %v4640_v25  ;;  %v4632_v36 = vunpack.i.h.bf16 %v4630_v22  ;;  %v4631_v55 = vunpack.i.l.bf16 %v4630_v22  ;;  %4574 = vmatprep.subr.msk.bf16.mxu0 %vm5077_vm5, %v3963_v23  ;;  %4582 = vmatprep.subr.msk.bf16.mxu1 %vm5081_vm6, %v3979_v5 }
 0x68e   : > { %4575 = vmatpush3.bf16.msk.msra.mxu0 %vm5077_vm5, %v3963_v23  ;;  %4583 = vmatpush3.bf16.msk.msra.mxu1 %vm5081_vm6, %v3979_v5 }
 0x68f   : > { %v3982_v37 = vpack.c.bf16 %v4642_v26, %v4641_v30  ;;  %v3968_v57 = vpack.c.bf16 %v4632_v36, %v4631_v55 }
 0x691   : > { %4576 = vmatprep.subr.msk.bf16.mxu0 %vm5077_vm5, %v3968_v57  ;;  %4584 = vmatprep.subr.msk.bf16.mxu1 %vm5081_vm6, %v3982_v37 }
 0x692   : > { %4577 = vmatpush3.bf16.msk.msra.mxu0 %vm5077_vm5, %v3968_v57  ;;  %4585 = vmatpush3.bf16.msk.msra.mxu1 %vm5081_vm6, %v3982_v37 }
 0x695   : > { %4579 = vmatmul.mubr.msk.bf16.vlgmr.msra.gmra.mxu0 %vm441_vm1, %v4653_v41  ;;  %4587 = vmatmul.mubr.msk.bf16.vlgmr.msra.gmra.mxu1 %vm441_vm1, %v4654_v62 }
 0x699   : > { %v3813_v38 = vpop.permute.xlu1 %3812  ;;  %v3818_v24 = vpop.permute.xlu0 %3817 }
 0x69d   : > { %v3823_v49 = vpop.permute.xlu1 %3822  ;;  %v3828_v56 = vpop.permute.xlu0 %3827 }
 0x6df   : > { %v4572_v27 = vpop.f32.mrf.mxu1 }
 0x6e1   : > { %v3654_v42 = vpop.f32.mrf.mxu1 }
 0x6e3   : > { %v4573_v45 = vpop.f32.mrf.mxu1 }
 0x6e5   : > { %v3657_v46 = vpop.f32.mrf.mxu1 }
 0x755   : > { %v4580_v47 = vpop.f32.mrf.mxu0  ;;  %v4588_v39 = vpop.f32.mrf.mxu1 }
 0x756   : > { %v3728_v48 = vadd.f32 %v4580_v47, %v4572_v27 }
 0x757   : > { %v3719_v35 = vpop.f32.mrf.mxu0  ;;  %v3791_v2 = vpop.f32.mrf.mxu1 }
 0x758   : > { %v3808_v40 = vadd.f32 %v4588_v39, %v3728_v48  ;;  %v3720_v50 = vadd.f32 %v3719_v35, %v3654_v42 }
 0x759   : > { %v4581_v18 = vpop.f32.mrf.mxu0  ;;  %v4589_v33 = vpop.f32.mrf.mxu1 }
 0x75a   : > { %v3832_v29 = vadd.f32 %v3823_v49, %v3808_v40  ;;  %v3806_v31 = vadd.f32 %v3791_v2, %v3720_v50  ;;  %v3731_v32 = vadd.f32 %v4581_v18, %v4573_v45 }
 0x75b   : > { %v3722_v34 = vpop.f32.mrf.mxu0  ;;  %v3794_v58 = vpop.f32.mrf.mxu1 }
 0x75c   : > { %v3836_v44 = vadd.f32 %v4703_v43, %v3832_v29  ;;  %v3830_v51 = vadd.f32 %v3813_v38, %v3806_v31  ;;  %v3809_v52 = vadd.f32 %v4589_v33, %v3731_v32  ;;  %v3723_v54 = vadd.f32 %v3722_v34, %v3657_v46 }
 0x75e   : > { %3840 = vst.msk [vmem:[%s386_s12 + $0x10] sm:$0xff] %vm404_vm0, %v3836_v44  ;;  %v3834_v4 = vadd.f32 %v4704_v63, %v3830_v51  ;;  %v3833_v6 = vadd.f32 %v3828_v56, %v3809_v52  ;;  %v3807_v7 = vadd.f32 %v3794_v58, %v3723_v54 }
 0x760   : > { %3838 = vst.msk [vmem:[%s386_s12] sm:$0xff] %vm404_vm0, %v3834_v4  ;;  %v3837_v53 = vadd.f32 %v4705_v1, %v3833_v6  ;;  %v3831_v61 = vadd.f32 %v3818_v24, %v3807_v7 }
 0x762   : > { %3841 = vst.msk [vmem:[%s386_s12 + $0x18] sm:$0xff] %vm404_vm0, %v3837_v53  ;;  %v3835_v59 = vadd.f32 %v4706_v0, %v3831_v61 }
 0x764   : > { %3839 = vst.msk [vmem:[%s386_s12 + $0x8] sm:$0xff] %vm404_vm0, %v3835_v59 }
 0x765 PF: > { %s21_s17 = sadd.s32 1, %s4713_s17  }
 0x766   : > { %p18_p4 = scmp.ge.s32.totalorder %s21_s17, 4  }
 0x768   :  { %20 = sbr.rel (!%p18_p4) target bundleno = 1 (0x1), region = 98 }

</bundles_post_ra>
